<compile_context>
chip_gen: v7x
topology: tpu7x:2x2x1
jax: 0.10.0
libtpu: 0.0.40
codegen_flags: <defaults>
</compile_context>

<pallas_src>
import jax
import jax.numpy as jnp
from jax.experimental import pallas as pl
from jax.experimental.pallas import tpu as pltpu

# Shapes implied by the module: Linear(6144, 1) with 128 channels -> 48 final
# positions -> input sequence length 200.
L_IN   = 200
EMB    = 3
C1, K1 = 16, 5
C2, K2 = 128, 2
L1 = L_IN - K1 + 1        # 196  (after conv1)
P1 = L1 // 2              # 98   (after pool1)
L2 = P1 - K2 + 1          # 97   (after conv2)
P2 = L2 // 2              # 48   (after pool2)
FLAT = C2 * P2            # 6144

ROW_SPAN = 10             # x positions feeding one pool2 output (x[4t .. 4t+9])
PATCH1   = ROW_SPAN * EMB  # 30  stage-1 input features per row
S1OUT    = 6 * C1          # 96  stage-1 outputs: 3 pooled positions x (even|odd) x 16 ch
PATCH2   = 3 * C1          # 48  stage-2 input features per row (3 pooled positions)
S2OUT    = 2 * C2          # 256 stage-2 outputs: (even|odd) pool2 member x 128 ch


def net_kernel(xp_ref, w1_ref, b1_ref, w2_ref, b2_ref, wl_ref, bl_ref, o_ref):
    bt = xp_ref.shape[1]                       # batch elements in this grid step
    m = P2 * bt                                # rows = (pool2 position, batch)

    # im2col'd activations: row (t, b) holds x[b, 4t .. 4t+9, :] flattened.
    xp = xp_ref[...].reshape(m, PATCH1)                                    # (m, 30)

    # conv1 (all 5 taps, 6 conv positions fused) -> pool1 (lane-half max) -> relu1
    a1 = jnp.dot(xp, w1_ref[...], preferred_element_type=jnp.float32) + b1_ref[...]
    h1 = jnp.maximum(jnp.maximum(a1[:, :PATCH2], a1[:, PATCH2:]), 0.0)     # (m, 48)

    # conv2 (both taps, 2 conv positions fused) -> pool2 -> relu2
    a2 = jnp.dot(h1, w2_ref[...], preferred_element_type=jnp.float32) + b2_ref[...]
    h2 = jnp.maximum(jnp.maximum(a2[:, :C2], a2[:, C2:]), 0.0)             # (m, 128)

    # Flatten + Linear(6144, 1) + Sigmoid, batch kept on the lane axis.
    z = h2.reshape(P2, bt, C2) * wl_ref[...]        # (48, bt, 128) * (48, 1, 128)
    s = jnp.sum(z, axis=0)                          # (bt, 128)
    y = jnp.sum(s, axis=1).reshape(1, bt) + bl_ref[...]                    # (1, bt)
    o_ref[...] = (1.0 / (1.0 + jnp.exp(-y))).astype(o_ref.dtype)


def net_forward(tokens, emb, w1, b1, w2, b2, wl, bl, *, b_tile=128):
    """tokens (B, 200) int32 -> (B, 1) f32.  b_tile must be a multiple of 8."""
    assert b_tile % 8 == 0
    B = tokens.shape[0]

    # TODO(synk): nn.Embedding lookup (data-dependent gather) stays in plain JAX;
    # all conv / pool / matmul / activation compute runs inside the Pallas kernel.
    x = jnp.take(emb, tokens, axis=0).astype(jnp.float32)                  # (B, 200, 3)

    # im2col (wrapper side): one row per (pool2 output position, batch element).
    pos = 4 * jnp.arange(P2)[:, None] + jnp.arange(ROW_SPAN)[None, :]      # (48, 10)
    xp = x[:, pos, :].reshape(B, P2, PATCH1)                               # (B, 48, 30)
    xp = jnp.transpose(xp, (1, 0, 2))                                      # (48, B, 30)

    n_blk = pl.cdiv(B, b_tile)
    b_pad = n_blk * b_tile
    if b_pad != B:
        xp = jnp.pad(xp, ((0, 0), (0, b_pad - B), (0, 0)))

    # ---- fused stage-1 weight (30, 96): conv1 taps for conv positions
    # 4t+2g (even half) and 4t+2g+1 (odd half), g = 0..2.
    w1t = jnp.transpose(w1, (2, 1, 0))                                     # (5,3,16) [k,c,o]
    d = jnp.arange(ROW_SPAN)[:, None]                                      # (10, 1)
    g = jnp.arange(3)[None, :]                                             # (1, 3)

    def stage1_half(shift):
        k = d - 2 * g - shift                                              # (10, 3)
        valid = ((k >= 0) & (k < K1)).astype(jnp.float32)
        taps = w1t[jnp.clip(k, 0, K1 - 1)] * valid[:, :, None, None]       # (10,3,3,16) [d,g,c,o]
        return jnp.transpose(taps, (0, 2, 1, 3)).reshape(PATCH1, 3 * C1)   # rows 3d+c, cols 16g+o

    w1k = jnp.concatenate([stage1_half(0), stage1_half(1)], axis=1)        # (30, 96)
    b1k = jnp.tile(b1, 6)[None, :]                                         # (1, 96)

    # ---- fused stage-2 weight (48, 256): conv2 taps for conv positions 2t / 2t+1.
    w2t = jnp.transpose(w2, (2, 1, 0))                                     # (2,16,128) [k,c,o]
    zblk = jnp.zeros((1, C1, C2), jnp.float32)
    even = jnp.concatenate([w2t, zblk], axis=0).reshape(PATCH2, C2)        # g = 0,1,2
    odd = jnp.concatenate([zblk, w2t], axis=0).reshape(PATCH2, C2)
    w2k = jnp.concatenate([even, odd], axis=1)                             # (48, 256)
    b2k = jnp.tile(b2, 2)[None, :]                                         # (1, 256)

    # ---- linear weight rearranged to (pool2 position, 1, channel) so it
    # broadcasts over the kernel's position-major (48, b_tile, 128) activations.
    wlk = wl[0].reshape(C2, P2).T.reshape(P2, 1, C2)                       # (48, 1, 128)
    blk = bl.reshape(1, 1)

    out = pl.pallas_call(
        net_kernel,
        out_shape=jax.ShapeDtypeStruct((n_blk, 1, b_tile), jnp.float32),
        grid_spec=pltpu.PrefetchScalarGridSpec(
            num_scalar_prefetch=0,
            grid=(n_blk,),
            in_specs=[
                pl.BlockSpec((P2, b_tile, PATCH1), lambda i: (0, i, 0)),   # activations
                pl.BlockSpec((PATCH1, S1OUT),      lambda i: (0, 0)),      # stage-1 weight
                pl.BlockSpec((1, S1OUT),           lambda i: (0, 0)),      # stage-1 bias
                pl.BlockSpec((PATCH2, S2OUT),      lambda i: (0, 0)),      # stage-2 weight
                pl.BlockSpec((1, S2OUT),           lambda i: (0, 0)),      # stage-2 bias
                pl.BlockSpec((P2, 1, C2),          lambda i: (0, 0, 0)),   # linear weight
                pl.BlockSpec((1, 1),               lambda i: (0, 0)),      # linear bias
            ],
            out_specs=pl.BlockSpec((None, 1, b_tile), lambda i: (i, 0, 0)),
        ),
        compiler_params=pltpu.CompilerParams(dimension_semantics=("parallel",)),
    )(xp, w1k, b1k, w2k, b2k, wlk, blk)
    return out.reshape(b_pad, 1)[:B]


def reference_forward(tokens, emb, w1, b1, w2, b2, wl, bl):
    """Pure-JAX reference mirroring the PyTorch module (NCL layout)."""
    x = jnp.take(emb, tokens, axis=0)                      # (B, L, 3)
    x = jnp.transpose(x, (0, 2, 1))                        # (B, 3, L)
    dn = ('NCH', 'OIH', 'NCH')
    h = jax.lax.conv_general_dilated(x, w1, (1,), 'VALID', dimension_numbers=dn,
                                     precision=jax.lax.Precision.HIGHEST)
    h = h + b1[None, :, None]
    h = jax.lax.reduce_window(h, -jnp.inf, jax.lax.max, (1, 1, 2), (1, 1, 2), 'VALID')
    h = jnp.maximum(h, 0.0)
    h = jax.lax.conv_general_dilated(h, w2, (1,), 'VALID', dimension_numbers=dn,
                                     precision=jax.lax.Precision.HIGHEST)
    h = h + b2[None, :, None]
    h = jax.lax.reduce_window(h, -jnp.inf, jax.lax.max, (1, 1, 2), (1, 1, 2), 'VALID')
    h = jnp.maximum(h, 0.0)
    flat = h.reshape(h.shape[0], -1)                       # (B, 6144) channel-major
    y = flat @ wl.T + bl
    return 1.0 / (1.0 + jnp.exp(-y))


if __name__ == "__main__":
    key = jax.random.PRNGKey(0)
    ks = jax.random.split(key, 8)

    # Deterministic synthetic parameters (shapes from Net.__init__).
    emb = jax.random.normal(ks[0], (10000, EMB), jnp.float32)
    emb = emb.at[1].set(0.0)                               # padding_idx=1
    w1 = jax.random.normal(ks[1], (C1, EMB, K1), jnp.float32) * 0.1   # Conv1d(3,16,5)
    b1 = jax.random.normal(ks[2], (C1,), jnp.float32) * 0.1
    w2 = jax.random.normal(ks[3], (C2, C1, K2), jnp.float32) * 0.1    # Conv1d(16,128,2)
    b2 = jax.random.normal(ks[4], (C2,), jnp.float32) * 0.1
    wl = jax.random.normal(ks[5], (1, FLAT), jnp.float32) * 0.1       # Linear(6144,1)
    bl = jax.random.normal(ks[6], (1,), jnp.float32) * 0.1

    B_DEMO = 16
    tokens = jax.random.randint(ks[7], (B_DEMO, L_IN), 0, 10000, dtype=jnp.int32)

    # Small demo tile (keeps the grid multi-step for v7x's two TensorCores);
    # production batches should use b_tile = 64..256.
    y = net_forward(tokens, emb, w1, b1, w2, b2, wl, bl, b_tile=8)
    y = jax.block_until_ready(y)

    y_ref = reference_forward(tokens, emb, w1, b1, w2, b2, wl, bl)
    assert y.shape == (B_DEMO, 1)
    assert bool(jnp.all(jnp.abs(y - y_ref) < 5e-3)), "mismatch vs reference"

    print("KERNEL_OK")
</pallas_src>

<mosaic_0001>
module attributes {stable_mosaic.version = 11 : i64} {
  func.func @net_kernel(%arg0: i32, %arg1: memref<48x8x30xf32, #tpu.memory_space<vmem>>, %arg2: memref<30x96xf32, #tpu.memory_space<vmem>>, %arg3: memref<1x96xf32, #tpu.memory_space<vmem>>, %arg4: memref<48x256xf32, #tpu.memory_space<vmem>>, %arg5: memref<1x256xf32, #tpu.memory_space<vmem>>, %arg6: memref<48x1x128xf32, #tpu.memory_space<vmem>>, %arg7: memref<1x1xf32, #tpu.memory_space<vmem>>, %arg8: memref<1x1x8xf32, #tpu.memory_space<vmem>>) attributes {dimension_semantics = [#tpu.dimension_semantics<parallel>], iteration_bounds = array<i64: 2>, scalar_prefetch = 0 : i64, scratch_operands = 0 : i64, tpu.core_type = #tpu.core_type<tc>, window_params = [{transform_indices = @transform_0, window_bounds = array<i64: 48, 8, 30>}, {pipeline_mode = #tpu.pipeline_mode<synchronous>, transform_indices = @transform_1, window_bounds = array<i64: 30, 96>}, {pipeline_mode = #tpu.pipeline_mode<synchronous>, transform_indices = @transform_2, window_bounds = array<i64: 1, 96>}, {pipeline_mode = #tpu.pipeline_mode<synchronous>, transform_indices = @transform_3, window_bounds = array<i64: 48, 256>}, {pipeline_mode = #tpu.pipeline_mode<synchronous>, transform_indices = @transform_4, window_bounds = array<i64: 1, 256>}, {pipeline_mode = #tpu.pipeline_mode<synchronous>, transform_indices = @transform_5, window_bounds = array<i64: 48, 1, 128>}, {pipeline_mode = #tpu.pipeline_mode<synchronous>, transform_indices = @transform_6, window_bounds = array<i64: 1, 1>}, {transform_indices = @transform_7, window_bounds = array<i64: 1, 1, 8>}]} {
    %c0 = arith.constant 0 : index
    %c0_0 = arith.constant 0 : index
    %c0_1 = arith.constant 0 : index
    %0 = vector.load %arg1[%c0, %c0_0, %c0_1] : memref<48x8x30xf32, #tpu.memory_space<vmem>>, vector<48x8x30xf32>
    %1 = vector.shape_cast %0 : vector<48x8x30xf32> to vector<384x30xf32>
    %c0_2 = arith.constant 0 : index
    %c0_3 = arith.constant 0 : index
    %2 = vector.load %arg2[%c0_2, %c0_3] : memref<30x96xf32, #tpu.memory_space<vmem>>, vector<30x96xf32>
    %cst = arith.constant dense<0.000000e+00> : vector<384x96xf32>
    %3 = tpu.matmul %1, %2, %cst {dimension_numbers = #tpu.dot_dimension_numbers<[1], [0], [0], [1], [0, 0, 1, 1], [], []>} : vector<384x30xf32>, vector<30x96xf32>, vector<384x96xf32> -> vector<384x96xf32>
    %c0_4 = arith.constant 0 : index
    %c0_5 = arith.constant 0 : index
    %4 = vector.load %arg3[%c0_4, %c0_5] : memref<1x96xf32, #tpu.memory_space<vmem>>, vector<1x96xf32>
    %5 = vector.broadcast %4 : vector<1x96xf32> to vector<384x96xf32>
    %6 = arith.addf %3, %5 : vector<384x96xf32>
    %7 = vector.extract_strided_slice %6 {offsets = [0, 0], sizes = [384, 48], strides = [1, 1]} : vector<384x96xf32> to vector<384x48xf32>
    %8 = vector.extract_strided_slice %6 {offsets = [0, 48], sizes = [384, 48], strides = [1, 1]} : vector<384x96xf32> to vector<384x48xf32>
    %9 = arith.maximumf %7, %8 : vector<384x48xf32>
    %cst_6 = arith.constant 0.000000e+00 : f32
    %10 = vector.broadcast %cst_6 : f32 to vector<384x48xf32>
    %11 = arith.maximumf %9, %10 : vector<384x48xf32>
    %c0_7 = arith.constant 0 : index
    %c0_8 = arith.constant 0 : index
    %12 = vector.load %arg4[%c0_7, %c0_8] : memref<48x256xf32, #tpu.memory_space<vmem>>, vector<48x256xf32>
    %cst_9 = arith.constant dense<0.000000e+00> : vector<384x256xf32>
    %13 = tpu.matmul %11, %12, %cst_9 {dimension_numbers = #tpu.dot_dimension_numbers<[1], [0], [0], [1], [0, 0, 1, 1], [], []>} : vector<384x48xf32>, vector<48x256xf32>, vector<384x256xf32> -> vector<384x256xf32>
    %c0_10 = arith.constant 0 : index
    %c0_11 = arith.constant 0 : index
    %14 = vector.load %arg5[%c0_10, %c0_11] : memref<1x256xf32, #tpu.memory_space<vmem>>, vector<1x256xf32>
    %15 = vector.broadcast %14 : vector<1x256xf32> to vector<384x256xf32>
    %16 = arith.addf %13, %15 : vector<384x256xf32>
    %17 = vector.extract_strided_slice %16 {offsets = [0, 0], sizes = [384, 128], strides = [1, 1]} : vector<384x256xf32> to vector<384x128xf32>
    %18 = vector.extract_strided_slice %16 {offsets = [0, 128], sizes = [384, 128], strides = [1, 1]} : vector<384x256xf32> to vector<384x128xf32>
    %19 = arith.maximumf %17, %18 : vector<384x128xf32>
    %cst_12 = arith.constant 0.000000e+00 : f32
    %20 = vector.broadcast %cst_12 : f32 to vector<384x128xf32>
    %21 = arith.maximumf %19, %20 : vector<384x128xf32>
    %22 = vector.shape_cast %21 : vector<384x128xf32> to vector<48x8x128xf32>
    %c0_13 = arith.constant 0 : index
    %c0_14 = arith.constant 0 : index
    %c0_15 = arith.constant 0 : index
    %23 = vector.load %arg6[%c0_13, %c0_14, %c0_15] : memref<48x1x128xf32, #tpu.memory_space<vmem>>, vector<48x1x128xf32>
    %24 = vector.broadcast %23 : vector<48x1x128xf32> to vector<48x8x128xf32>
    %25 = arith.mulf %22, %24 : vector<48x8x128xf32>
    %cst_16 = arith.constant dense<0.000000e+00> : vector<8x128xf32>
    %26 = vector.multi_reduction <add>, %25, %cst_16 [0] : vector<48x8x128xf32> to vector<8x128xf32>
    %cst_17 = arith.constant dense<0.000000e+00> : vector<8xf32>
    %27 = vector.multi_reduction <add>, %26, %cst_17 [1] : vector<8x128xf32> to vector<8xf32>
    %28 = vector.shape_cast %27 : vector<8xf32> to vector<1x8xf32>
    %c0_18 = arith.constant 0 : index
    %c0_19 = arith.constant 0 : index
    %29 = vector.load %arg7[%c0_18, %c0_19] : memref<1x1xf32, #tpu.memory_space<vmem>>, vector<1x1xf32>
    %30 = vector.broadcast %29 : vector<1x1xf32> to vector<1x8xf32>
    %31 = arith.addf %28, %30 : vector<1x8xf32>
    %cst_20 = arith.constant 0.000000e+00 : f32
    %32 = vector.broadcast %cst_20 : f32 to vector<1x8xf32>
    %33 = arith.subf %32, %31 : vector<1x8xf32>
    %34 = math.exp %33 : vector<1x8xf32>
    %cst_21 = arith.constant 1.000000e+00 : f32
    %35 = vector.broadcast %cst_21 : f32 to vector<1x8xf32>
    %36 = arith.addf %35, %34 : vector<1x8xf32>
    %cst_22 = arith.constant 1.000000e+00 : f32
    %37 = vector.broadcast %cst_22 : f32 to vector<1x8xf32>
    %38 = arith.divf %37, %36 : vector<1x8xf32>
    %c0_23 = arith.constant 0 : index
    %c0_24 = arith.constant 0 : index
    %c0_25 = arith.constant 0 : index
    %39 = vector.load %arg8[%c0_23, %c0_24, %c0_25] : memref<1x1x8xf32, #tpu.memory_space<vmem>>, vector<1x1x8xf32>
    %40 = vector.shape_cast %39 : vector<1x1x8xf32> to vector<1x8xf32>
    %41 = vector.shape_cast %38 : vector<1x8xf32> to vector<1x1x8xf32>
    tpu.vector_store %arg8[%c0_23, %c0_24, %c0_25], %41 {strides = array<i32>} : memref<1x1x8xf32, #tpu.memory_space<vmem>>, vector<1x1x8xf32>,
    return
  }
  func.func @transform_0(%arg0: i32) -> (i32, i32, i32) {
    %c0_i32 = arith.constant 0 : i32
    %c0_i32_0 = arith.constant 0 : i32
    %c0_i32_1 = arith.constant 0 : i32
    return %c0_i32, %arg0, %c0_i32_0 : i32, i32, i32
  }
  func.func @transform_1(%arg0: i32) -> (i32, i32) {
    %c0_i32 = arith.constant 0 : i32
    %c0_i32_0 = arith.constant 0 : i32
    %c0_i32_1 = arith.constant 0 : i32
    return %c0_i32, %c0_i32_0 : i32, i32
  }
  func.func @transform_2(%arg0: i32) -> (i32, i32) {
    %c0_i32 = arith.constant 0 : i32
    %c0_i32_0 = arith.constant 0 : i32
    %c0_i32_1 = arith.constant 0 : i32
    return %c0_i32, %c0_i32_0 : i32, i32
  }
  func.func @transform_3(%arg0: i32) -> (i32, i32) {
    %c0_i32 = arith.constant 0 : i32
    %c0_i32_0 = arith.constant 0 : i32
    %c0_i32_1 = arith.constant 0 : i32
    return %c0_i32, %c0_i32_0 : i32, i32
  }
  func.func @transform_4(%arg0: i32) -> (i32, i32) {
    %c0_i32 = arith.constant 0 : i32
    %c0_i32_0 = arith.constant 0 : i32
    %c0_i32_1 = arith.constant 0 : i32
    return %c0_i32, %c0_i32_0 : i32, i32
  }
  func.func @transform_5(%arg0: i32) -> (i32, i32, i32) {
    %c0_i32 = arith.constant 0 : i32
    %c0_i32_0 = arith.constant 0 : i32
    %c0_i32_1 = arith.constant 0 : i32
    %c0_i32_2 = arith.constant 0 : i32
    return %c0_i32, %c0_i32_0, %c0_i32_1 : i32, i32, i32
  }
  func.func @transform_6(%arg0: i32) -> (i32, i32) {
    %c0_i32 = arith.constant 0 : i32
    %c0_i32_0 = arith.constant 0 : i32
    %c0_i32_1 = arith.constant 0 : i32
    return %c0_i32, %c0_i32_0 : i32, i32
  }
  func.func @transform_7(%arg0: i32) -> (i32, i32, i32) {
    %c0_i32 = arith.constant 0 : i32
    %c0_i32_0 = arith.constant 0 : i32
    %c0_i32_1 = arith.constant 0 : i32
    return %arg0, %c0_i32, %c0_i32_0 : i32, i32, i32
  }
}

</mosaic_0001>

<bundles_post_ra>
// kernel: tpu_custom_call.1
= control target key start
LH: loop header
LB: loop body
LE: loop exit
PB: predicated region body
PF: predicated region fallthrough
CT: control target
= control target key end

     0   :  { %s4137_s0 = inlined_call_operand.vmem [shape: f32[48,16,30], index: 0, kind: input, shape index: {}]   ;;  %s4138_s1 = inlined_call_operand.vmem [shape: f32[30,96], index: 1, kind: input, shape index: {}]   ;;  %s4139_s2 = inlined_call_operand.vmem [shape: f32[1,96], index: 2, kind: input, shape index: {}]   ;;  %s4140_s3 = inlined_call_operand.vmem [shape: f32[48,256], index: 3, kind: input, shape index: {}]   ;;  %s4141_s4 = inlined_call_operand.vmem [shape: f32[1,256], index: 4, kind: input, shape index: {}]   ;;  %s4142_s5 = inlined_call_operand.vmem [shape: f32[48,1,128], index: 5, kind: input, shape index: {}]   ;;  %s4143_s6 = inlined_call_operand.<no memory space> [shape: f32[1,1], index: 6, kind: input, shape index: {}]   ;;  %s4144_s7 = inlined_call_operand.hbm [shape: f32[2,1,8], index: 7, kind: output, shape index: {}]  }
   0x1   :  { %v12_v0 = vstv %s4143_s6 }
   0x2   :  { %13 = vst [vmem:[#allocation2] sm:$0x1] %v12_v0 }
   0x3   :  { %14 = vsyncpa [#allocation5], 0 }
   0x4   :  { %16 = vsyncpa [#allocation5 + $0x1], 0  ;;  %s2930_s26 = smov 0   ;;  %s2932_s27 = smov 0  }
   0x5   :  { %s2934_s28 = smov 0   ;;  %s2936_s29 = smov 0  }
   0x6 LB: > { %s2452_s6 = sadd.s32 4294967295, %s2880_s29   ;;  %s2453_s30 = sadd.s32 4294967294, %s2880_s29   ;;  %s2880_s29 = sphi %s2936_s29, %s4152_s29   ;;  %s2876_s28 = sphi %s2934_s28, %s4151_s28   ;;  %s2872_s27 = sphi %s2932_s27, %s4150_s27   ;;  %s2868_s26 = sphi %s2930_s26, %s4149_s26  }
   0x7   : > { %s2953_s8 = sadd.s32 1, %s2880_s29   ;;  %s29_s9 = sadd.s32 1, %s2876_s28 }
   0x8   : > { %s26_s10 = ssub.s32 %s2880_s29, %s2953_s8  ;;  %p36_p0 = scmp.ne.s32.totalorder %s2876_s28, %s2872_s27 }
   0x9   : > { %p27_p1 = scmp.eq.s32.totalorder %s26_s10, 0  ;;  %p37_p2 = scmp.eq.s32.totalorder %s2880_s29, 0 }
   0xa   : > { %p192_p3 = scmp.eq.s32.totalorder %s2452_s6, 1  ;;  %p197_p4 = scmp.ne.s32.totalorder %s2872_s27, %s2868_s26 }
   0xb   : > { %s2966_s11 = scalar_select %p27_p1, %s2876_s28, %s29_s9  }
   0xc   : > { %p38_p5 = por %p37_p2, %p36_p0  ;;  %p2968_p6 = por %p192_p3, %p36_p0 }
   0xd   : > { %p198_p7 = scmp.eq.s32.totalorder %s2453_s30, 1  ;;  %p2455_p9 = scmp.ge.s32.totalorder %s2880_s29, 2 }
   0xf   : > { %p2972_p8 = por %p198_p7, %p197_p4  ;;  %232 = sbr.rel (%p2455_p9) target bundleno = 50 (0x32), region = 40 }
  0x16   : > { %235 = sbr.rel (!%p38_p5) target bundleno = 50 (0x32), region = 44  ;;  %s237_s14 = sand.u32 (%p38_p5), 1, %s2876_s28  }
  0x17   : > { %s2456_s15 = sshll.u32 (%p38_p5), %s2880_s29, 3  ;;  %s2767_s16 = smul.u32 (%p38_p5), 384, %s237_s14 }
  0x18   : > { %s2984_s19 = scalar_lea.vmem (%p38_p5), %s4137_s0, %s2456_s15 }
  0x19   : > { %v363_v1 = vld [vmem:[%s2984_s19] sm:$0xff] (%p38_p5)  ;;  %v365_v2 = vld [vmem:[%s2984_s19 + $0x10] sm:$0xff] (%p38_p5)  ;;  %s2992_s20 = scalar_lea.vmem (%p38_p5), [#allocation3], %s2767_s16 }
  0x1a   : > { %v367_v3 = vld [vmem:[%s2984_s19 + $0x20] sm:$0xff] (%p38_p5)  ;;  %v369_v4 = vld [vmem:[%s2984_s19 + $0x30] sm:$0xff] (%p38_p5)  ;;  %364 = vst [vmem:[%s2992_s20] sm:$0xff] (%p38_p5), %v363_v1  ;;  %366 = vst [vmem:[%s2992_s20 + $0x8] sm:$0xff] (%p38_p5), %v365_v2 }
  0x1b   : > { %v371_v5 = vld [vmem:[%s2984_s19 + $0x40] sm:$0xff] (%p38_p5)  ;;  %v373_v6 = vld [vmem:[%s2984_s19 + $0x50] sm:$0xff] (%p38_p5)  ;;  %368 = vst [vmem:[%s2992_s20 + $0x10] sm:$0xff] (%p38_p5), %v367_v3  ;;  %370 = vst [vmem:[%s2992_s20 + $0x18] sm:$0xff] (%p38_p5), %v369_v4 }
  0x1c   : > { %372 = vst [vmem:[%s2992_s20 + $0x20] sm:$0xff] (%p38_p5), %v371_v5  ;;  %374 = vst [vmem:[%s2992_s20 + $0x28] sm:$0xff] (%p38_p5), %v373_v6  ;;  %v375_v7 = vld [vmem:[%s2984_s19 + $0x60] sm:$0xff] (%p38_p5)  ;;  %v377_v8 = vld [vmem:[%s2984_s19 + $0x70] sm:$0xff] (%p38_p5) }
  0x1d   : > { %v379_v9 = vld [vmem:[%s2984_s19 + $0x80] sm:$0xff]  ;;  %376 = vst [vmem:[%s2992_s20 + $0x30] sm:$0xff] %v375_v7  ;;  %378 = vst [vmem:[%s2992_s20 + $0x38] sm:$0xff] %v377_v8  ;;  %v381_v10 = vld [vmem:[%s2984_s19 + $0x90] sm:$0xff] }
  0x1e   : > { %380 = vst [vmem:[%s2992_s20 + $0x40] sm:$0xff] %v379_v9  ;;  %v383_v11 = vld [vmem:[%s2984_s19 + $0xa0] sm:$0xff]  ;;  %v385_v12 = vld [vmem:[%s2984_s19 + $0xb0] sm:$0xff]  ;;  %382 = vst [vmem:[%s2992_s20 + $0x48] sm:$0xff] %v381_v10 }
  0x1f   : > { %384 = vst [vmem:[%s2992_s20 + $0x50] sm:$0xff] %v383_v11  ;;  %386 = vst [vmem:[%s2992_s20 + $0x58] sm:$0xff] %v385_v12  ;;  %v387_v13 = vld [vmem:[%s2984_s19 + $0xc0] sm:$0xff]  ;;  %v389_v14 = vld [vmem:[%s2984_s19 + $0xd0] sm:$0xff] }
  0x20   : > { %v391_v15 = vld [vmem:[%s2984_s19 + $0xe0] sm:$0xff]  ;;  %388 = vst [vmem:[%s2992_s20 + $0x60] sm:$0xff] %v387_v13  ;;  %390 = vst [vmem:[%s2992_s20 + $0x68] sm:$0xff] %v389_v14  ;;  %v393_v16 = vld [vmem:[%s2984_s19 + $0xf0] sm:$0xff] }
  0x21   : > { %392 = vst [vmem:[%s2992_s20 + $0x70] sm:$0xff] %v391_v15  ;;  %v395_v17 = vld [vmem:[%s2984_s19 + $0x100] sm:$0xff]  ;;  %v397_v18 = vld [vmem:[%s2984_s19 + $0x110] sm:$0xff]  ;;  %394 = vst [vmem:[%s2992_s20 + $0x78] sm:$0xff] %v393_v16 }
  0x22   : > { %396 = vst [vmem:[%s2992_s20 + $0x80] sm:$0xff] %v395_v17  ;;  %398 = vst [vmem:[%s2992_s20 + $0x88] sm:$0xff] %v397_v18  ;;  %v399_v19 = vld [vmem:[%s2984_s19 + $0x120] sm:$0xff]  ;;  %v401_v20 = vld [vmem:[%s2984_s19 + $0x130] sm:$0xff] }
  0x23   : > { %v403_v21 = vld [vmem:[%s2984_s19 + $0x140] sm:$0xff]  ;;  %400 = vst [vmem:[%s2992_s20 + $0x90] sm:$0xff] %v399_v19  ;;  %402 = vst [vmem:[%s2992_s20 + $0x98] sm:$0xff] %v401_v20  ;;  %v405_v22 = vld [vmem:[%s2984_s19 + $0x150] sm:$0xff] }
  0x24   : > { %404 = vst [vmem:[%s2992_s20 + $0xa0] sm:$0xff] %v403_v21  ;;  %v407_v23 = vld [vmem:[%s2984_s19 + $0x160] sm:$0xff]  ;;  %v409_v24 = vld [vmem:[%s2984_s19 + $0x170] sm:$0xff]  ;;  %406 = vst [vmem:[%s2992_s20 + $0xa8] sm:$0xff] %v405_v22 }
  0x25   : > { %408 = vst [vmem:[%s2992_s20 + $0xb0] sm:$0xff] %v407_v23  ;;  %410 = vst [vmem:[%s2992_s20 + $0xb8] sm:$0xff] %v409_v24  ;;  %v411_v25 = vld [vmem:[%s2984_s19 + $0x180] sm:$0xff]  ;;  %v413_v26 = vld [vmem:[%s2984_s19 + $0x190] sm:$0xff] }
  0x26   : > { %v415_v27 = vld [vmem:[%s2984_s19 + $0x1a0] sm:$0xff]  ;;  %412 = vst [vmem:[%s2992_s20 + $0xc0] sm:$0xff] %v411_v25  ;;  %414 = vst [vmem:[%s2992_s20 + $0xc8] sm:$0xff] %v413_v26  ;;  %v417_v28 = vld [vmem:[%s2984_s19 + $0x1b0] sm:$0xff] }
  0x27   : > { %416 = vst [vmem:[%s2992_s20 + $0xd0] sm:$0xff] %v415_v27  ;;  %v419_v29 = vld [vmem:[%s2984_s19 + $0x1c0] sm:$0xff]  ;;  %v421_v30 = vld [vmem:[%s2984_s19 + $0x1d0] sm:$0xff]  ;;  %418 = vst [vmem:[%s2992_s20 + $0xd8] sm:$0xff] %v417_v28 }
  0x28   : > { %420 = vst [vmem:[%s2992_s20 + $0xe0] sm:$0xff] %v419_v29  ;;  %422 = vst [vmem:[%s2992_s20 + $0xe8] sm:$0xff] %v421_v30  ;;  %v423_v31 = vld [vmem:[%s2984_s19 + $0x1e0] sm:$0xff]  ;;  %v425_v32 = vld [vmem:[%s2984_s19 + $0x1f0] sm:$0xff] }
  0x29   : > { %v427_v33 = vld [vmem:[%s2984_s19 + $0x200] sm:$0xff]  ;;  %424 = vst [vmem:[%s2992_s20 + $0xf0] sm:$0xff] %v423_v31  ;;  %426 = vst [vmem:[%s2992_s20 + $0xf8] sm:$0xff] %v425_v32  ;;  %v429_v34 = vld [vmem:[%s2984_s19 + $0x210] sm:$0xff] }
  0x2a   : > { %428 = vst [vmem:[%s2992_s20 + $0x100] sm:$0xff] %v427_v33  ;;  %v431_v35 = vld [vmem:[%s2984_s19 + $0x220] sm:$0xff]  ;;  %v433_v36 = vld [vmem:[%s2984_s19 + $0x230] sm:$0xff]  ;;  %430 = vst [vmem:[%s2992_s20 + $0x108] sm:$0xff] %v429_v34 }
  0x2b   : > { %432 = vst [vmem:[%s2992_s20 + $0x110] sm:$0xff] %v431_v35  ;;  %434 = vst [vmem:[%s2992_s20 + $0x118] sm:$0xff] %v433_v36  ;;  %v435_v37 = vld [vmem:[%s2984_s19 + $0x240] sm:$0xff]  ;;  %v437_v38 = vld [vmem:[%s2984_s19 + $0x250] sm:$0xff] }
  0x2c   : > { %v439_v39 = vld [vmem:[%s2984_s19 + $0x260] sm:$0xff]  ;;  %436 = vst [vmem:[%s2992_s20 + $0x120] sm:$0xff] %v435_v37  ;;  %438 = vst [vmem:[%s2992_s20 + $0x128] sm:$0xff] %v437_v38  ;;  %v441_v40 = vld [vmem:[%s2984_s19 + $0x270] sm:$0xff] }
  0x2d   : > { %440 = vst [vmem:[%s2992_s20 + $0x130] sm:$0xff] %v439_v39  ;;  %v443_v41 = vld [vmem:[%s2984_s19 + $0x280] sm:$0xff]  ;;  %v445_v42 = vld [vmem:[%s2984_s19 + $0x290] sm:$0xff]  ;;  %442 = vst [vmem:[%s2992_s20 + $0x138] sm:$0xff] %v441_v40 }
  0x2e   : > { %444 = vst [vmem:[%s2992_s20 + $0x140] sm:$0xff] %v443_v41  ;;  %446 = vst [vmem:[%s2992_s20 + $0x148] sm:$0xff] %v445_v42  ;;  %v447_v43 = vld [vmem:[%s2984_s19 + $0x2a0] sm:$0xff]  ;;  %v449_v44 = vld [vmem:[%s2984_s19 + $0x2b0] sm:$0xff] }
  0x2f   : > { %v451_v45 = vld [vmem:[%s2984_s19 + $0x2c0] sm:$0xff]  ;;  %448 = vst [vmem:[%s2992_s20 + $0x150] sm:$0xff] %v447_v43  ;;  %450 = vst [vmem:[%s2992_s20 + $0x158] sm:$0xff] %v449_v44  ;;  %v453_v46 = vld [vmem:[%s2984_s19 + $0x2d0] sm:$0xff] }
  0x30   : > { %452 = vst [vmem:[%s2992_s20 + $0x160] sm:$0xff] %v451_v45  ;;  %v455_v47 = vld [vmem:[%s2984_s19 + $0x2e0] sm:$0xff]  ;;  %v457_v48 = vld [vmem:[%s2984_s19 + $0x2f0] sm:$0xff]  ;;  %454 = vst [vmem:[%s2992_s20 + $0x168] sm:$0xff] %v453_v46 }
  0x31   : > { %456 = vst [vmem:[%s2992_s20 + $0x170] sm:$0xff] %v455_v47  ;;  %458 = vst [vmem:[%s2992_s20 + $0x178] sm:$0xff] %v457_v48 }
  0x32 PF: > { %p2457_p10 = scmp.ge.s32.totalorder %s2880_s29, 1  ;;  %p463_p11 = scmp.lt.s32.totalorder %s2880_s29, 3 }
  0x34   : > { %p464_p12 = pnand %p2457_p10, %p463_p11 }
  0x35   : > { %v548_v49 = vld [vmem:[%s4138_s1] sm:$0xff] (!%p464_p12)  ;;  %v549_v50 = vld [vmem:[%s4138_s1 + $0x8] sm:$0xff] (!%p464_p12)  ;;  %v550_v51 = vld [vmem:[%s4138_s1 + $0x10] sm:$0xff] (!%p464_p12)  ;;  %vm704_vm0 = vcmask (!%p464_p12), 1045504   ;;  %s3096_s9 = sand.u32 (!%p464_p12), 1, %s2872_s27   ;;  %vm2882_vm1 = vmmov (!%p464_p12), 1  }
  0x36   : > { %467 = sbr.rel (%p464_p12) target bundleno = 973 (0x3cd), region = 82  ;;  %v2739_v52 = vpack.c.bf16 (!%p464_p12), %v549_v50, %v548_v49  ;;  %v551_v53 = vld [vmem:[%s4138_s1 + $0x18] sm:$0x3f] (!%p464_p12)  ;;  %vm2744_vm2 = vmpackc.low (!%p464_p12), %vm704_vm0, %vm2882_vm1  ;;  %vm559_vm3 = vcmask (!%p464_p12), 244736   ;;  %v1302_v39 = vld [vmem:[%s4140_s3 + $0x8] sm:$0xff] (!%p464_p12)  ;;  %vm1325_vm4 = vcmask (!%p464_p12), 392192  }
  0x37   : > { %s2768_s15 = smul.u32 (!%p464_p12), 384, %s3096_s9  ;;  %v2743_v54 = vpack.c.bf16 (!%p464_p12), %v551_v53, %v550_v51  ;;  %v1304_v40 = vld [vmem:[%s4140_s3 + $0x18] sm:$0xff] (!%p464_p12)  ;;  %v1301_v41 = vld [vmem:[%s4140_s3] sm:$0xff] (!%p464_p12)  ;;  %v1303_v43 = vld [vmem:[%s4140_s3 + $0x10] sm:$0xff] (!%p464_p12)  ;;  %s499_s17 = scalar_lea.vmem (!%p464_p12), [#allocation4], %s3096_s9  ;;  %vm2377_vm5 = vcmask (!%p464_p12), 57344  }
  0x38   : > { %2740 = vmatprep.subr.bf16.mxu0 (!%p464_p12), %v2739_v52  ;;  %v2749_v42 = vpack.c.bf16 (!%p464_p12), %v1304_v40, %v1302_v39  ;;  %v2751_v44 = vpack.c.bf16 (!%p464_p12), %v1303_v43, %v1301_v41  ;;  %v1306_v45 = vld [vmem:[%s4140_s3 + $0x28] sm:$0xff] (!%p464_p12)  ;;  %v1308_v46 = vld [vmem:[%s4140_s3 + $0x38] sm:$0xff] (!%p464_p12)  ;;  %v1305_v47 = vld [vmem:[%s4140_s3 + $0x20] sm:$0xff] (!%p464_p12)  ;;  %s2392_s18 = sshll.u32 (!%p464_p12), %s499_s17, 4  ;;  %s2380_s22 = scalar_lea.sflag (!%p464_p12), [#allocation5], %s3096_s9  ;;  %s4095_s18 = int_to_ptr.vmem [resolvable:$true] %s2392_s18 }
  0x39   : > { %2742 = vmatpush3.bf16.msra.mxu0 (!%p464_p12), %v2739_v52  ;;  %s3102_s16 = scalar_lea.vmem (!%p464_p12), [#allocation3], %s2768_s15  ;;  %v2753_v48 = vpack.c.bf16 (!%p464_p12), %v1308_v46, %v1306_v45  ;;  %v1307_v49 = vld [vmem:[%s4140_s3 + $0x30] sm:$0xff] (!%p464_p12)  ;;  %v1310_v51 = vld [vmem:[%s4140_s3 + $0x48] sm:$0xff] (!%p464_p12)  ;;  %v1312_v52 = vld [vmem:[%s4140_s3 + $0x58] sm:$0xff] (!%p464_p12)  ;;  %s2884_s15 = smov (!%p464_p12), 80  }
  0x3a   : > { %v500_v55 = vld [vmem:[%s3102_s16] sm:$0xff] (!%p464_p12)  ;;  %2745 = vmatprep.subr.msk.bf16.mxu0 (!%p464_p12), %vm2744_vm2, %v2743_v54  ;;  %v501_v56 = vld [vmem:[%s3102_s16 + $0x8] sm:$0xff] (!%p464_p12)  ;;  %v502_v57 = vld [vmem:[%s3102_s16 + $0x10] sm:$0xff] (!%p464_p12)  ;;  %2761 = vmatprep.subr.bf16.mxu1 (!%p464_p12), %v2749_v42  ;;  %v2755_v50 = vpack.c.bf16 (!%p464_p12), %v1307_v49, %v1305_v47  ;;  %s2818_s23 = scalar_lea.vmem (!%p464_p12), %s4095_s18, 16 }
  0x3b   : > { %2667 = vmatprep.mubr.msk.f32.mxu0 (!%p464_p12), %vm559_vm3, %v500_v55  ;;  %v503_v58 = vld [vmem:[%s3102_s16 + $0x18] sm:$0xff] (!%p464_p12)  ;;  %v504_v59 = vld [vmem:[%s3102_s16 + $0x20] sm:$0xff] (!%p464_p12)  ;;  %v505_v60 = vld [vmem:[%s3102_s16 + $0x28] sm:$0xff] (!%p464_p12)  ;;  %2764 = vmatpush1.bf16.msra.mxu1 (!%p464_p12), %v2751_v44  ;;  %p2819_p13 = scmp.ne.s32.totalorder (!%p464_p12), %s4095_s18, %s2818_s23 }
  0x3c   : > { %v506_v61 = vld [vmem:[%s3102_s16 + $0x30] sm:$0xff] (!%p464_p12)  ;;  %v507_v62 = vld [vmem:[%s3102_s16 + $0x38] sm:$0xff] (!%p464_p12)  ;;  %v508_v63 = vld [vmem:[%s3102_s16 + $0x40] sm:$0xff] (!%p464_p12)  ;;  %2762 = vmatprep.subr.bf16.mxu1 (!%p464_p12), %v2753_v48 }
  0x3d   : > { %2748 = vmatpush3.bf16.msk.msra.mxu0 %vm2744_vm2, %v2743_v54  ;;  %v509_v0 = vld [vmem:[%s3102_s16 + $0x48] sm:$0xff]  ;;  %v510_v1 = vld [vmem:[%s3102_s16 + $0x50] sm:$0xff]  ;;  %v511_v2 = vld [vmem:[%s3102_s16 + $0x58] sm:$0xff]  ;;  %v2757_v54 = vpack.c.bf16 %v1312_v52, %v1310_v51  ;;  %p2820_p0 = pnand %p2819_p13, %p2968_p6 }
  0x3e   : > { %v512_v3 = vld [vmem:[%s3102_s16 + $0x60] sm:$0xff]  ;;  %v513_v4 = vld [vmem:[%s3102_s16 + $0x68] sm:$0xff]  ;;  %v514_v5 = vld [vmem:[%s3102_s16 + $0x70] sm:$0xff]  ;;  %2750 = vmatprep.subr.bf16.mxu0 %v2749_v42 }
  0x3f   : > { %v515_v6 = vld [vmem:[%s3102_s16 + $0x78] sm:$0xff]  ;;  %v516_v7 = vld [vmem:[%s3102_s16 + $0x80] sm:$0xff]  ;;  %v517_v8 = vld [vmem:[%s3102_s16 + $0x88] sm:$0xff]  ;;  %2765 = vmatpush1.bf16.msra.mxu1 %v2755_v50  ;;  %p2821_p1 = pneg %p2820_p0 }
  0x40   : > { %2668 = vmatmul.mubr.msk.f32.vlgmr.msra.gmra.mrb[0].mxu0 %vm559_vm3, %v501_v56  ;;  %v518_v9 = vld [vmem:[%s3102_s16 + $0x90] sm:$0xff]  ;;  %v519_v10 = vld [vmem:[%s3102_s16 + $0x98] sm:$0xff]  ;;  %v520_v11 = vld [vmem:[%s3102_s16 + $0xa0] sm:$0xff]  ;;  %2763 = vmatprep.subr.bf16.mxu1 %v2757_v54 }
  0x41   : > { %2670 = vmatprep.mubr.msk.f32.mxu0 %vm559_vm3, %v502_v57  ;;  %v521_v12 = vld [vmem:[%s3102_s16 + $0xa8] sm:$0xff]  ;;  %v522_v13 = vld [vmem:[%s3102_s16 + $0xb0] sm:$0xff]  ;;  %v523_v14 = vld [vmem:[%s3102_s16 + $0xb8] sm:$0xff]  ;;  %2752 = vmatpush1.bf16.msra.mxu0 %v2751_v44 }
  0x42   : > { %v524_v15 = vld [vmem:[%s3102_s16 + $0xc0] sm:$0xff]  ;;  %v525_v16 = vld [vmem:[%s3102_s16 + $0xc8] sm:$0xff]  ;;  %v526_v17 = vld [vmem:[%s3102_s16 + $0xd0] sm:$0xff]  ;;  %2754 = vmatprep.subr.bf16.mxu0 %v2753_v48 }
  0x43   : > { %v527_v18 = vld [vmem:[%s3102_s16 + $0xd8] sm:$0xff]  ;;  %v528_v19 = vld [vmem:[%s3102_s16 + $0xe0] sm:$0xff]  ;;  %v529_v20 = vld [vmem:[%s3102_s16 + $0xe8] sm:$0xff] }
  0x44   : > { %2671 = vmatmul.mubr.msk.f32.gmra.mrb[2].mxu0 %vm559_vm3, %v503_v58  ;;  %v530_v21 = vld [vmem:[%s3102_s16 + $0xf0] sm:$0xff]  ;;  %v531_v22 = vld [vmem:[%s3102_s16 + $0xf8] sm:$0xff]  ;;  %v532_v23 = vld [vmem:[%s3102_s16 + $0x100] sm:$0xff] }
  0x45   : > { %2673 = vmatprep.mubr.msk.f32.mxu0 %vm559_vm3, %v504_v59  ;;  %v533_v24 = vld [vmem:[%s3102_s16 + $0x108] sm:$0xff]  ;;  %v534_v25 = vld [vmem:[%s3102_s16 + $0x110] sm:$0xff]  ;;  %v535_v26 = vld [vmem:[%s3102_s16 + $0x118] sm:$0xff]  ;;  %2756 = vmatpush1.bf16.msra.mxu0 %v2755_v50 }
  0x46   : > { %v536_v27 = vld [vmem:[%s3102_s16 + $0x120] sm:$0xff]  ;;  %v537_v28 = vld [vmem:[%s3102_s16 + $0x128] sm:$0xff]  ;;  %v538_v29 = vld [vmem:[%s3102_s16 + $0x130] sm:$0xff]  ;;  %2758 = vmatprep.subr.bf16.mxu0 %v2757_v54 }
  0x47   : > { %v539_v30 = vld [vmem:[%s3102_s16 + $0x138] sm:$0xff]  ;;  %v540_v31 = vld [vmem:[%s3102_s16 + $0x140] sm:$0xff]  ;;  %v541_v32 = vld [vmem:[%s3102_s16 + $0x148] sm:$0xff] }
  0x48   : > { %2674 = vmatmul.mubr.msk.f32.gmra.mrb[4].mxu0 %vm559_vm3, %v505_v60  ;;  %v542_v33 = vld [vmem:[%s3102_s16 + $0x150] sm:$0xff]  ;;  %v543_v34 = vld [vmem:[%s3102_s16 + $0x158] sm:$0xff]  ;;  %v544_v35 = vld [vmem:[%s3102_s16 + $0x160] sm:$0xff] }
  0x49   : > { %2676 = vmatprep.mubr.msk.f32.mxu0 %vm559_vm3, %v506_v61  ;;  %v545_v36 = vld [vmem:[%s3102_s16 + $0x168] sm:$0xff]  ;;  %v546_v37 = vld [vmem:[%s3102_s16 + $0x170] sm:$0xff]  ;;  %v547_v38 = vld [vmem:[%s3102_s16 + $0x178] sm:$0xff]  ;;  %s2604_s16 = sshll.u32 %s2452_s6, 4  ;;  %s2886_s6 = smov [#allocation4]  }
  0x4a   : > { %v1309_v53 = vld [vmem:[%s4140_s3 + $0x40] sm:$0xff]  ;;  %v1311_v55 = vld [vmem:[%s4140_s3 + $0x50] sm:$0xff]  ;;  %s4093_s21 = scalar_lea.hbm %s4144_s7, %s2604_s16  ;;  %s2822_s24 = sshll.u32 %s2886_s6, 4  ;;  %s2823_s24 = int_to_ptr.vmem [resolvable:$false] %s2822_s24 }
  0x4b   : > { %v2759_v56 = vpack.c.bf16 %v1311_v55, %v1309_v53  ;;  %s2824_s25 = scalar_lea.vmem %s2823_s24, 32  ;;  %p2825_p2 = scmp.lt.s32.totalorder %s4095_s18, %s2823_s24 }
  0x4c   : > { %2677 = vmatmul.mubr.msk.f32.gmra.mrb[6].mxu0 %vm559_vm3, %v507_v62  ;;  %p2826_p3 = scmp.lt.s32.totalorder %s2824_s25, %s2818_s23 }
  0x4d   : > { %2679 = vmatprep.mubr.msk.f32.mxu0 %vm559_vm3, %v508_v63  ;;  %2760 = vmatpush1.bf16.msra.mxu0 %v2759_v56 }
  0x4e   : > { %2766 = vmatpush1.bf16.msra.mxu1 %v2759_v56  ;;  %p2827_p4 = por %p2826_p3, %p2825_p2 }
  0x50   : > { %2680 = vmatmul.mubr.msk.f32.gmra.mrb[8].mxu0 %vm559_vm3, %v509_v0  ;;  %p2828_p5 = pnand %p2827_p4, %p2821_p1 }
  0x51   : > { %2682 = vmatprep.mubr.msk.f32.mxu0 %vm559_vm3, %v510_v1 }
  0x54   : > { %2683 = vmatmul.mubr.msk.f32.gmra.mrb[10].mxu0 %vm559_vm3, %v511_v2 }
  0x55   : > { %2685 = vmatprep.mubr.msk.f32.mxu0 %vm559_vm3, %v512_v3  ;;  %v2883_v3 = vmov 0.0  }
  0x56   : > { %1606 = vmatprep.mubr.f32.mxu1 %v2883_v3 }
  0x58   : > { %2686 = vmatmul.mubr.msk.f32.gmra.mrb[12].mxu0 %vm559_vm3, %v513_v4 }
  0x59   : > { %2688 = vmatprep.mubr.msk.f32.mxu0 %vm559_vm3, %v514_v5 }
  0x5c   : > { %2689 = vmatmul.mubr.msk.f32.gmra.mrb[14].mxu0 %vm559_vm3, %v515_v6 }
  0x5d   : > { %2691 = vmatprep.mubr.msk.f32.mxu0 %vm559_vm3, %v516_v7  ;;  %v3253_v7 = vld [vmem:[%s4139_s2] ss:$0 sm:$0xff] }
  0x60   : > { %2692 = vmatmul.mubr.msk.f32.gmra.mrb[16].mxu0 %vm559_vm3, %v517_v8 }
  0x61   : > { %2694 = vmatprep.mubr.msk.f32.mxu0 %vm559_vm3, %v518_v9 }
  0x64   : > { %2695 = vmatmul.mubr.msk.f32.gmra.mrb[18].mxu0 %vm559_vm3, %v519_v10 }
  0x65   : > { %2697 = vmatprep.mubr.msk.f32.mxu0 %vm559_vm3, %v520_v11 }
  0x68   : > { %2698 = vmatmul.mubr.msk.f32.gmra.mrb[20].mxu0 %vm559_vm3, %v521_v12 }
  0x69   : > { %2700 = vmatprep.mubr.msk.f32.mxu0 %vm559_vm3, %v522_v13 }
  0x6c   : > { %2701 = vmatmul.mubr.msk.f32.gmra.mrb[22].mxu0 %vm559_vm3, %v523_v14 }
  0x6d   : > { %2703 = vmatprep.mubr.msk.f32.mxu0 %vm559_vm3, %v524_v15 }
  0x70   : > { %2704 = vmatmul.mubr.msk.f32.gmra.mrb[24].mxu0 %vm559_vm3, %v525_v16 }
  0x71   : > { %2706 = vmatprep.mubr.msk.f32.mxu0 %vm559_vm3, %v526_v17 }
  0x74   : > { %2707 = vmatmul.mubr.msk.f32.gmra.mrb[26].mxu0 %vm559_vm3, %v527_v18 }
  0x75   : > { %2709 = vmatprep.mubr.msk.f32.mxu0 %vm559_vm3, %v528_v19 }
  0x78   : > { %2710 = vmatmul.mubr.msk.f32.gmra.mrb[28].mxu0 %vm559_vm3, %v529_v20 }
  0x79   : > { %2712 = vmatprep.mubr.msk.f32.mxu0 %vm559_vm3, %v530_v21 }
  0x7c   : > { %2713 = vmatmul.mubr.msk.f32.gmra.mrb[30].mxu0 %vm559_vm3, %v531_v22 }
  0x7d   : > { %2715 = vmatprep.mubr.msk.f32.mxu0 %vm559_vm3, %v532_v23 }
  0x80   : > { %2716 = vmatmul.mubr.msk.f32.gmra.mrb[32].mxu0 %vm559_vm3, %v533_v24 }
  0x81   : > { %2718 = vmatprep.mubr.msk.f32.mxu0 %vm559_vm3, %v534_v25 }
  0x84   : > { %2719 = vmatmul.mubr.msk.f32.gmra.mrb[34].mxu0 %vm559_vm3, %v535_v26 }
  0x85   : > { %2721 = vmatprep.mubr.msk.f32.mxu0 %vm559_vm3, %v536_v27 }
  0x88   : > { %2722 = vmatmul.mubr.msk.f32.gmra.mrb[36].mxu0 %vm559_vm3, %v537_v28 }
  0x89   : > { %2724 = vmatprep.mubr.msk.f32.mxu0 %vm559_vm3, %v538_v29 }
  0x8c   : > { %2725 = vmatmul.mubr.msk.f32.gmra.mrb[38].mxu0 %vm559_vm3, %v539_v30 }
  0x8d   : > { %2727 = vmatprep.mubr.msk.f32.mxu0 %vm559_vm3, %v540_v31 }
  0x90   : > { %2728 = vmatmul.mubr.msk.f32.gmra.mrb[40].mxu0 %vm559_vm3, %v541_v32 }
  0x91   : > { %2730 = vmatprep.mubr.msk.f32.mxu0 %vm559_vm3, %v542_v33 }
  0x94   : > { %2731 = vmatmul.mubr.msk.f32.gmra.mrb[42].mxu0 %vm559_vm3, %v543_v34 }
  0x95   : > { %2733 = vmatprep.mubr.msk.f32.mxu0 %vm559_vm3, %v544_v35 }
  0x98   : > { %2734 = vmatmul.mubr.msk.f32.gmra.mrb[44].mxu0 %vm559_vm3, %v545_v36 }
  0x99   : > { %2736 = vmatprep.mubr.msk.f32.mxu0 %vm559_vm3, %v546_v37 }
  0x9c   : > { %2737 = vmatmul.mubr.msk.f32.gmra.mrb[46].mxu0 %vm559_vm3, %v547_v38 }
  0x9d   : > { %1534 = vmatprep.mubr.f32.mxu0 %v2883_v3 }
 0x113   : > { %v2669_v57 = vpop.f32.mrb[0].mxu0 }
 0x114   : > { %v774_v58 = vpop.f32.mrb[1].mxu0  ;;  %v3294_v25 = vadd.f32 %v2669_v57, %v3253_v7 }
 0x115   : > { %v3284_v21 = vadd.f32 %v3253_v7, %v774_v58 }
 0x117   : > { %v2672_v59 = vpop.f32.mrb[2].mxu0 }
 0x118   : > { %v784_v60 = vpop.f32.mrb[3].mxu0  ;;  %v3314_v33 = vadd.f32 %v2672_v59, %v3253_v7 }
 0x119   : > { %v3304_v29 = vadd.f32 %v3253_v7, %v784_v60 }
 0x11b   : > { %v2675_v61 = vpop.f32.mrb[4].mxu0 }
 0x11c   : > { %v794_v62 = vpop.f32.mrb[5].mxu0  ;;  %v3334_v41 = vadd.f32 %v2675_v61, %v3253_v7 }
 0x11d   : > { %v3324_v37 = vadd.f32 %v3253_v7, %v794_v62 }
 0x11f   : > { %v3236_v63 = vpop.f32.mrb[6].mxu0 }
 0x120   : > { %v3238_v0 = vpop.f32.mrb[7].mxu0  ;;  %v3356_v49 = vadd.f32 %v3236_v63, %v3253_v7 }
 0x121   : > { %v3345_v45 = vadd.f32 %v3253_v7, %v3238_v0 }
 0x123   : > { %v3240_v1 = vpop.f32.mrb[8].mxu0 }
 0x124   : > { %v3242_v2 = vpop.f32.mrb[9].mxu0  ;;  %v3378_v57 = vadd.f32 %v3240_v1, %v3253_v7 }
 0x125   : > { %v3367_v53 = vadd.f32 %v3253_v7, %v3242_v2 }
 0x127   : > { %v3246_v4 = vpop.f32.mrb[10].mxu0 }
 0x128   : > { %v3248_v5 = vpop.f32.mrb[11].mxu0  ;;  %v3400_v1 = vadd.f32 %v3246_v4, %v3253_v7 }
 0x129   : > { %v3389_v61 = vadd.f32 %v3253_v7, %v3248_v5 }
 0x12b   : > { %v2687_v6 = vpop.f32.mrb[12].mxu0 }
 0x12c   : > { %v834_v8 = vpop.f32.mrb[13].mxu0  ;;  %v3261_v12 = vadd.f32 %v2687_v6, %v3253_v7 }
 0x12d   : > { %v3256_v9 = vadd.f32 %v3253_v7, %v834_v8 }
 0x12f   : > { %v2690_v10 = vpop.f32.mrb[14].mxu0  ;;  %1085 = vrot.lane.b32.xlu0 %v3256_v9, %s2884_s15 }
 0x130   : > { %v844_v11 = vpop.f32.mrb[15].mxu0  ;;  %v3267_v14 = vadd.f32 %v2690_v10, %v3253_v7 }
 0x131   : > { %v3264_v13 = vadd.f32 %v3253_v7, %v844_v11 }
 0x133   : > { %v2693_v15 = vpop.f32.mrb[16].mxu0  ;;  %1089 = vrot.lane.b32.xlu1 %v3264_v13, %s2884_s15  ;;  %1087 = vrot.lane.b32.xlu0 %v3261_v12, %s2884_s15 }
 0x134   : > { %v854_v16 = vpop.f32.mrb[17].mxu0  ;;  %v3277_v18 = vadd.f32 %v2693_v15, %v3253_v7 }
 0x135   : > { %v3274_v17 = vadd.f32 %v3253_v7, %v854_v16 }
 0x137   : > { %1091 = vrot.lane.b32.xlu1 %v3267_v14, %s2884_s15  ;;  %1093 = vrot.lane.b32.xlu0 %v3274_v17, %s2884_s15  ;;  %v2696_v19 = vpop.f32.mrb[18].mxu0 }
 0x138   : > { %v864_v20 = vpop.f32.mrb[19].mxu0  ;;  %v3297_v26 = vadd.f32 %v2696_v19, %v3253_v7 }
 0x139   : > { %v3291_v22 = vadd.f32 %v3253_v7, %v864_v20 }
 0x13b   : > { %1095 = vrot.lane.b32.xlu1 %v3277_v18, %s2884_s15  ;;  %1061 = vrot.lane.b32.xlu0 %v3284_v21, %s2884_s15  ;;  %v2699_v23 = vpop.f32.mrb[20].mxu0 }
 0x13c   : > { %v874_v24 = vpop.f32.mrb[21].mxu0  ;;  %v3317_v34 = vadd.f32 %v2699_v23, %v3253_v7 }
 0x13d   : > { %v3311_v30 = vadd.f32 %v3253_v7, %v874_v24 }
 0x13f   : > { %1097 = vrot.lane.b32.xlu1 %v3291_v22, %s2884_s15  ;;  %1063 = vrot.lane.b32.xlu0 %v3294_v25, %s2884_s15  ;;  %v2702_v27 = vpop.f32.mrb[22].mxu0 }
 0x140   : > { %v884_v28 = vpop.f32.mrb[23].mxu0  ;;  %v3337_v42 = vadd.f32 %v2702_v27, %v3253_v7 }
 0x141   : > { %v3331_v38 = vadd.f32 %v3253_v7, %v884_v28 }
 0x143   : > { %1099 = vrot.lane.b32.xlu1 %v3297_v26, %s2884_s15  ;;  %1065 = vrot.lane.b32.xlu0 %v3304_v29, %s2884_s15  ;;  %v2705_v31 = vpop.f32.mrb[24].mxu0 }
 0x144   : > { %v894_v32 = vpop.f32.mrb[25].mxu0  ;;  %v3359_v50 = vadd.f32 %v2705_v31, %v3253_v7 }
 0x145   : > { %v3352_v46 = vadd.f32 %v3253_v7, %v894_v32 }
 0x147   : > { %1101 = vrot.lane.b32.xlu1 %v3311_v30, %s2884_s15  ;;  %1067 = vrot.lane.b32.xlu0 %v3314_v33, %s2884_s15  ;;  %v2708_v35 = vpop.f32.mrb[26].mxu0 }
 0x148   : > { %v904_v36 = vpop.f32.mrb[27].mxu0  ;;  %v3381_v58 = vadd.f32 %v2708_v35, %v3253_v7 }
 0x149   : > { %v3374_v54 = vadd.f32 %v3253_v7, %v904_v36 }
 0x14b   : > { %1103 = vrot.lane.b32.xlu1 %v3317_v34, %s2884_s15  ;;  %1069 = vrot.lane.b32.xlu0 %v3324_v37, %s2884_s15  ;;  %v2711_v39 = vpop.f32.mrb[28].mxu0 }
 0x14c   : > { %v914_v40 = vpop.f32.mrb[29].mxu0  ;;  %v3403_v2 = vadd.f32 %v2711_v39, %v3253_v7 }
 0x14d   : > { %v3396_v62 = vadd.f32 %v3253_v7, %v914_v40 }
 0x14f   : > { %1105 = vrot.lane.b32.xlu1 %v3331_v38, %s2884_s15  ;;  %1071 = vrot.lane.b32.xlu0 %v3334_v41, %s2884_s15  ;;  %v2714_v43 = vpop.f32.mrb[30].mxu0 }
 0x150   : > { %v924_v44 = vpop.f32.mrb[31].mxu0  ;;  %v3413_v10 = vadd.f32 %v2714_v43, %v3253_v7 }
 0x151   : > { %v3410_v5 = vadd.f32 %v3253_v7, %v924_v44 }
 0x153   : > { %1107 = vrot.lane.b32.xlu1 %v3337_v42, %s2884_s15  ;;  %1073 = vrot.lane.b32.xlu0 %v3345_v45, %s2884_s15  ;;  %v2717_v47 = vpop.f32.mrb[32].mxu0 }
 0x154   : > { %v934_v48 = vpop.f32.mrb[33].mxu0  ;;  %v3423_v16 = vadd.f32 %v2717_v47, %v3253_v7 }
 0x155   : > { %v3420_v4 = vadd.f32 %v3253_v7, %v934_v48 }
 0x157   : > { %1109 = vrot.lane.b32.xlu1 %v3352_v46, %s2884_s15  ;;  %1075 = vrot.lane.b32.xlu0 %v3356_v49, %s2884_s15  ;;  %v2720_v51 = vpop.f32.mrb[34].mxu0 }
 0x158   : > { %v944_v52 = vpop.f32.mrb[35].mxu0  ;;  %v3433_v24 = vadd.f32 %v2720_v51, %v3253_v7 }
 0x159   : > { %v3430_v19 = vadd.f32 %v3253_v7, %v944_v52 }
 0x15b   : > { %1111 = vrot.lane.b32.xlu1 %v3359_v50, %s2884_s15  ;;  %1077 = vrot.lane.b32.xlu0 %v3367_v53, %s2884_s15  ;;  %v2723_v55 = vpop.f32.mrb[36].mxu0 }
 0x15c   : > { %v954_v56 = vpop.f32.mrb[37].mxu0  ;;  %v3443_v28 = vadd.f32 %v2723_v55, %v3253_v7 }
 0x15d   : > { %v3440_v27 = vadd.f32 %v3253_v7, %v954_v56 }
 0x15f   : > { %1113 = vrot.lane.b32.xlu1 %v3374_v54, %s2884_s15  ;;  %1079 = vrot.lane.b32.xlu0 %v3378_v57, %s2884_s15  ;;  %v2726_v59 = vpop.f32.mrb[38].mxu0 }
 0x160   : > { %v964_v60 = vpop.f32.mrb[39].mxu0  ;;  %v3453_v32 = vadd.f32 %v2726_v59, %v3253_v7 }
 0x161   : > { %v3450_v31 = vadd.f32 %v3253_v7, %v964_v60 }
 0x163   : > { %1115 = vrot.lane.b32.xlu1 %v3381_v58, %s2884_s15  ;;  %1081 = vrot.lane.b32.xlu0 %v3389_v61, %s2884_s15  ;;  %v2729_v63 = vpop.f32.mrb[40].mxu0 }
 0x164   : > { %v974_v0 = vpop.f32.mrb[41].mxu0  ;;  %v3463_v36 = vadd.f32 %v2729_v63, %v3253_v7 }
 0x165   : > { %v3460_v35 = vadd.f32 %v3253_v7, %v974_v0 }
 0x167   : > { %1117 = vrot.lane.b32.xlu1 %v3396_v62, %s2884_s15  ;;  %1083 = vrot.lane.b32.xlu0 %v3400_v1, %s2884_s15  ;;  %v2732_v6 = vpop.f32.mrb[42].mxu0 }
 0x168   : > { %v984_v8 = vpop.f32.mrb[43].mxu0  ;;  %v3473_v40 = vadd.f32 %v2732_v6, %v3253_v7 }
 0x169   : > { %v3470_v39 = vadd.f32 %v3253_v7, %v984_v8 }
 0x16b   : > { %1119 = vrot.lane.b32.xlu1 %v3403_v2, %s2884_s15  ;;  %1121 = vrot.lane.b32.xlu0 %v3410_v5, %s2884_s15  ;;  %v2735_v11 = vpop.f32.mrb[44].mxu0 }
 0x16c   : > { %v994_v15 = vpop.f32.mrb[45].mxu0  ;;  %v3483_v44 = vadd.f32 %v2735_v11, %v3253_v7 }
 0x16d   : > { %v3480_v43 = vadd.f32 %v3253_v7, %v994_v15 }
 0x16f   : > { %1123 = vrot.lane.b32.xlu1 %v3413_v10, %s2884_s15  ;;  %1125 = vrot.lane.b32.xlu0 %v3420_v4, %s2884_s15  ;;  %v2738_v20 = vpop.f32.mrb[46].mxu0 }
 0x170   : > { %v1004_v23 = vpop.f32.mrb[47].mxu0  ;;  %v3493_v48 = vadd.f32 %v2738_v20, %v3253_v7 }
 0x171   : > { %v3490_v47 = vadd.f32 %v3253_v7, %v1004_v23 }
 0x173   : > { %1127 = vrot.lane.b32.xlu1 %v3423_v16, %s2884_s15  ;;  %1129 = vrot.lane.b32.xlu0 %v3430_v19, %s2884_s15 }
 0x177   : > { %1131 = vrot.lane.b32.xlu1 %v3433_v24, %s2884_s15  ;;  %1133 = vrot.lane.b32.xlu0 %v3440_v27, %s2884_s15 }
 0x17b   : > { %1135 = vrot.lane.b32.xlu1 %v3443_v28, %s2884_s15  ;;  %1137 = vrot.lane.b32.xlu0 %v3450_v31, %s2884_s15 }
 0x17f   : > { %1139 = vrot.lane.b32.xlu1 %v3453_v32, %s2884_s15  ;;  %1141 = vrot.lane.b32.xlu0 %v3460_v35, %s2884_s15 }
 0x183   : > { %1143 = vrot.lane.b32.xlu1 %v3463_v36, %s2884_s15  ;;  %1145 = vrot.lane.b32.xlu0 %v3470_v39, %s2884_s15 }
 0x187   : > { %1147 = vrot.lane.b32.xlu1 %v3473_v40, %s2884_s15  ;;  %1149 = vrot.lane.b32.xlu0 %v3480_v43, %s2884_s15 }
 0x18b   : > { %1151 = vrot.lane.b32.xlu1 %v3483_v44, %s2884_s15  ;;  %1153 = vrot.lane.b32.xlu0 %v3490_v47, %s2884_s15 }
 0x18f   : > { %1155 = vrot.lane.b32.xlu1 %v3493_v48, %s2884_s15 }
 0x1a1   : > { %v1086_v51 = vpop.permute.xlu0 %1085 }
 0x1a2   : > { %v1217_v52 = vmax.f32 %v3256_v9, %v1086_v51 }
 0x1a4   : > { %v1265_v55 = vmax.f32 %v1217_v52, 0.0 }
 0x1a5   : > { %v1090_v56 = vpop.permute.xlu1 %1089  ;;  %v1088_v59 = vpop.permute.xlu0 %1087 }
 0x1a6   : > { %v1218_v60 = vmax.f32 %v3261_v12, %v1088_v59  ;;  %2520 = vmatmul.mubr.msk.f32.vlgmr.msra.gmra.mrb[0].mxu1 %vm1325_vm4, %v1265_v55  ;;  %v1219_v7 = vmax.f32 %v3264_v13, %v1090_v56 }
 0x1a7   : > { %1612 = vmatprep.mubr.f32.mxu1 %v2883_v3 }
 0x1a8   : > { %v1266_v63 = vmax.f32 %v1218_v60, 0.0  ;;  %v1267_v9 = vmax.f32 %v1219_v7, 0.0 }
 0x1a9   : > { %v1092_v0 = vpop.permute.xlu1 %1091  ;;  %v1094_v6 = vpop.permute.xlu0 %1093 }
 0x1aa   : > { %2521 = vmatmul.mubr.msk.f32.gmra.mrb[2].mxu1 %vm1325_vm4, %v1266_v63  ;;  %v1220_v8 = vmax.f32 %v3267_v14, %v1092_v0  ;;  %v1221_v13 = vmax.f32 %v3274_v17, %v1094_v6 }
 0x1ab   : > { %1618 = vmatprep.mubr.f32.mxu1 %v2883_v3 }
 0x1ac   : > { %v1268_v20 = vmax.f32 %v1220_v8, 0.0  ;;  %v1269_v14 = vmax.f32 %v1221_v13, 0.0 }
 0x1ad   : > { %v1096_v11 = vpop.permute.xlu1 %1095  ;;  %v1062_v15 = vpop.permute.xlu0 %1061 }
 0x1ae   : > { %v1205_v12 = vmax.f32 %v3284_v21, %v1062_v15  ;;  %2522 = vmatmul.mubr.msk.f32.gmra.mrb[4].mxu1 %vm1325_vm4, %v1267_v9  ;;  %v1222_v21 = vmax.f32 %v3277_v18, %v1096_v11 }
 0x1af   : > { %1624 = vmatprep.mubr.f32.mxu1 %v2883_v3 }
 0x1b0   : > { %v1253_v23 = vmax.f32 %v1205_v12, 0.0 }
 0x1b1   : > { %v1098_v51 = vpop.permute.xlu1 %1097  ;;  %v1064_v52 = vpop.permute.xlu0 %1063 }
 0x1b2   : > { %v1206_v55 = vmax.f32 %v3294_v25, %v1064_v52  ;;  %2508 = vmatmul.mubr.msk.f32.vlgmr.msra.gmra.mrb[48].mxu0 %vm1325_vm4, %v1253_v23  ;;  %2523 = vmatmul.mubr.msk.f32.gmra.mrb[6].mxu1 %vm1325_vm4, %v1268_v20  ;;  %v1270_v25 = vmax.f32 %v1222_v21, 0.0  ;;  %v1223_v7 = vmax.f32 %v3291_v22, %v1098_v51 }
 0x1b3   : > { %1540 = vmatprep.mubr.f32.mxu0 %v2883_v3  ;;  %1630 = vmatprep.mubr.f32.mxu1 %v2883_v3 }
 0x1b4   : > { %v1254_v56 = vmax.f32 %v1206_v55, 0.0 }
 0x1b5   : > { %v1100_v59 = vpop.permute.xlu1 %1099  ;;  %v1066_v60 = vpop.permute.xlu0 %1065 }
 0x1b6   : > { %v1207_v17 = vmax.f32 %v3304_v29, %v1066_v60  ;;  %2509 = vmatmul.mubr.msk.f32.gmra.mrb[50].mxu0 %vm1325_vm4, %v1254_v56  ;;  %2524 = vmatmul.mubr.msk.f32.gmra.mrb[8].mxu1 %vm1325_vm4, %v1269_v14  ;;  %v1271_v29 = vmax.f32 %v1223_v7, 0.0  ;;  %v1224_v9 = vmax.f32 %v3297_v26, %v1100_v59 }
 0x1b7   : > { %1546 = vmatprep.mubr.f32.mxu0 %v2883_v3  ;;  %1636 = vmatprep.mubr.f32.mxu1 %v2883_v3 }
 0x1b8   : > { %v1255_v63 = vmax.f32 %v1207_v17, 0.0 }
 0x1b9   : > { %v1102_v0 = vpop.permute.xlu1 %1101  ;;  %v1068_v6 = vpop.permute.xlu0 %1067 }
 0x1ba   : > { %v1208_v18 = vmax.f32 %v3314_v33, %v1068_v6  ;;  %2510 = vmatmul.mubr.msk.f32.gmra.mrb[52].mxu0 %vm1325_vm4, %v1255_v63  ;;  %2525 = vmatmul.mubr.msk.f32.gmra.mrb[10].mxu1 %vm1325_vm4, %v1270_v25  ;;  %v1272_v33 = vmax.f32 %v1224_v9, 0.0  ;;  %v1225_v12 = vmax.f32 %v3311_v30, %v1102_v0 }
 0x1bb   : > { %1552 = vmatprep.mubr.f32.mxu0 %v2883_v3  ;;  %1642 = vmatprep.mubr.f32.mxu1 %v2883_v3 }
 0x1bc   : > { %v1256_v8 = vmax.f32 %v1208_v18, 0.0 }
 0x1bd   : > { %v1104_v11 = vpop.permute.xlu1 %1103  ;;  %v1070_v15 = vpop.permute.xlu0 %1069 }
 0x1be   : > { %v1209_v22 = vmax.f32 %v3324_v37, %v1070_v15  ;;  %2511 = vmatmul.mubr.msk.f32.gmra.mrb[54].mxu0 %vm1325_vm4, %v1256_v8  ;;  %2526 = vmatmul.mubr.msk.f32.gmra.mrb[12].mxu1 %vm1325_vm4, %v1271_v29  ;;  %v1273_v37 = vmax.f32 %v1225_v12, 0.0  ;;  %v1226_v51 = vmax.f32 %v3317_v34, %v1104_v11 }
 0x1bf   : > { %1558 = vmatprep.mubr.f32.mxu0 %v2883_v3  ;;  %1648 = vmatprep.mubr.f32.mxu1 %v2883_v3 }
 0x1c0   : > { %v1257_v20 = vmax.f32 %v1209_v22, 0.0 }
 0x1c1   : > { %v1106_v13 = vpop.permute.xlu1 %1105  ;;  %v1072_v23 = vpop.permute.xlu0 %1071 }
 0x1c2   : > { %v1210_v26 = vmax.f32 %v3334_v41, %v1072_v23  ;;  %2512 = vmatmul.mubr.msk.f32.gmra.mrb[56].mxu0 %vm1325_vm4, %v1257_v20  ;;  %2527 = vmatmul.mubr.msk.f32.gmra.mrb[14].mxu1 %vm1325_vm4, %v1272_v33  ;;  %v1274_v41 = vmax.f32 %v1226_v51, 0.0  ;;  %v1227_v21 = vmax.f32 %v3331_v38, %v1106_v13 }
 0x1c3   : > { %1564 = vmatprep.mubr.f32.mxu0 %v2883_v3  ;;  %1654 = vmatprep.mubr.f32.mxu1 %v2883_v3 }
 0x1c4   : > { %v1258_v52 = vmax.f32 %v1210_v26, 0.0 }
 0x1c5   : > { %v1108_v55 = vpop.permute.xlu1 %1107  ;;  %v1074_v14 = vpop.permute.xlu0 %1073 }
 0x1c6   : > { %v1211_v30 = vmax.f32 %v3345_v45, %v1074_v14  ;;  %2513 = vmatmul.mubr.msk.f32.gmra.mrb[58].mxu0 %vm1325_vm4, %v1258_v52  ;;  %2528 = vmatmul.mubr.msk.f32.gmra.mrb[16].mxu1 %vm1325_vm4, %v1273_v37  ;;  %v1275_v45 = vmax.f32 %v1227_v21, 0.0  ;;  %v1228_v17 = vmax.f32 %v3337_v42, %v1108_v55 }
 0x1c7   : > { %1570 = vmatprep.mubr.f32.mxu0 %v2883_v3  ;;  %1660 = vmatprep.mubr.f32.mxu1 %v2883_v3 }
 0x1c8   : > { %v1259_v56 = vmax.f32 %v1211_v30, 0.0 }
 0x1c9   : > { %v1110_v59 = vpop.permute.xlu1 %1109  ;;  %v1076_v60 = vpop.permute.xlu0 %1075 }
 0x1ca   : > { %v1212_v34 = vmax.f32 %v3356_v49, %v1076_v60  ;;  %2514 = vmatmul.mubr.msk.f32.gmra.mrb[60].mxu0 %vm1325_vm4, %v1259_v56  ;;  %2529 = vmatmul.mubr.msk.f32.gmra.mrb[18].mxu1 %vm1325_vm4, %v1274_v41  ;;  %v1276_v49 = vmax.f32 %v1228_v17, 0.0  ;;  %v1229_v0 = vmax.f32 %v3352_v46, %v1110_v59 }
 0x1cb   : > { %1576 = vmatprep.mubr.f32.mxu0 %v2883_v3  ;;  %1666 = vmatprep.mubr.f32.mxu1 %v2883_v3 }
 0x1cc   : > { %v1260_v25 = vmax.f32 %v1212_v34, 0.0 }
 0x1cd   : > { %v1112_v7 = vpop.permute.xlu1 %1111  ;;  %v1078_v63 = vpop.permute.xlu0 %1077 }
 0x1ce   : > { %v1213_v38 = vmax.f32 %v3367_v53, %v1078_v63  ;;  %2515 = vmatmul.mubr.msk.f32.gmra.mrb[62].mxu0 %vm1325_vm4, %v1260_v25  ;;  %2530 = vmatmul.mubr.msk.f32.gmra.mrb[20].mxu1 %vm1325_vm4, %v1275_v45  ;;  %v1277_v53 = vmax.f32 %v1229_v0, 0.0  ;;  %v1230_v9 = vmax.f32 %v3359_v50, %v1112_v7 }
 0x1cf   : > { %1582 = vmatprep.mubr.f32.mxu0 %v2883_v3  ;;  %1672 = vmatprep.mubr.f32.mxu1 %v2883_v3 }
 0x1d0   : > { %v1261_v6 = vmax.f32 %v1213_v38, 0.0 }
 0x1d1   : > { %v1114_v18 = vpop.permute.xlu1 %1113  ;;  %v1080_v29 = vpop.permute.xlu0 %1079 }
 0x1d2   : > { %v1214_v42 = vmax.f32 %v3378_v57, %v1080_v29  ;;  %2516 = vmatmul.mubr.msk.f32.gmra.mrb[64].mxu0 %vm1325_vm4, %v1261_v6  ;;  %2531 = vmatmul.mubr.msk.f32.gmra.mrb[22].mxu1 %vm1325_vm4, %v1276_v49  ;;  %v1278_v57 = vmax.f32 %v1230_v9, 0.0  ;;  %v1231_v22 = vmax.f32 %v3374_v54, %v1114_v18 }
 0x1d3   : > { %1588 = vmatprep.mubr.f32.mxu0 %v2883_v3  ;;  %1678 = vmatprep.mubr.f32.mxu1 %v2883_v3 }
 0x1d4   : > { %v1262_v8 = vmax.f32 %v1214_v42, 0.0  ;;  %v1279_v20 = vmax.f32 %v1231_v22, 0.0 }
 0x1d5   : > { %v1116_v11 = vpop.permute.xlu1 %1115  ;;  %v1082_v15 = vpop.permute.xlu0 %1081 }
 0x1d6   : > { %v1215_v46 = vmax.f32 %v3389_v61, %v1082_v15  ;;  %2517 = vmatmul.mubr.msk.f32.gmra.mrb[66].mxu0 %vm1325_vm4, %v1262_v8  ;;  %2532 = vmatmul.mubr.msk.f32.gmra.mrb[24].mxu1 %vm1325_vm4, %v1277_v53  ;;  %v1232_v13 = vmax.f32 %v3381_v58, %v1116_v11 }
 0x1d7   : > { %1594 = vmatprep.mubr.f32.mxu0 %v2883_v3  ;;  %1684 = vmatprep.mubr.f32.mxu1 %v2883_v3 }
 0x1d8   : > { %v1263_v33 = vmax.f32 %v1215_v46, 0.0  ;;  %v1280_v54 = vmax.f32 %v1232_v13, 0.0 }
 0x1d9   : > { %v1084_v12 = vpop.permute.xlu0 %1083  ;;  %v1118_v61 = vpop.permute.xlu1 %1117 }
 0x1da   : > { %v1216_v50 = vmax.f32 %v3400_v1, %v1084_v12  ;;  %2518 = vmatmul.mubr.msk.f32.gmra.mrb[68].mxu0 %vm1325_vm4, %v1263_v33  ;;  %2533 = vmatmul.mubr.msk.f32.gmra.mrb[26].mxu1 %vm1325_vm4, %v1278_v57  ;;  %v1233_v1 = vmax.f32 %v3396_v62, %v1118_v61 }
 0x1db   : > { %1600 = vmatprep.mubr.f32.mxu0 %v2883_v3  ;;  %1690 = vmatprep.mubr.f32.mxu1 %v2883_v3 }
 0x1dc   : > { %v1264_v23 = vmax.f32 %v1216_v50, 0.0  ;;  %v1281_v37 = vmax.f32 %v1233_v1, 0.0  ;;  %v1313_v1 = vld [vmem:[%s4141_s4] sm:$0x3] }
 0x1dd   : > { %v1120_v26 = vpop.permute.xlu1 %1119  ;;  %v1122_v52 = vpop.permute.xlu0 %1121 }
 0x1de   : > { %2519 = vmatmul.mubr.msk.f32.gmra.mrb[70].mxu0 %vm1325_vm4, %v1264_v23  ;;  %2534 = vmatmul.mubr.msk.f32.gmra.mrb[28].mxu1 %vm1325_vm4, %v1279_v20  ;;  %v1234_v51 = vmax.f32 %v3403_v2, %v1120_v26  ;;  %v1235_v55 = vmax.f32 %v3410_v5, %v1122_v52  ;;  %v4145_v23 = vlaneseq }
 0x1df   : > { %1696 = vmatprep.mubr.f32.mxu1 %v2883_v3 }
 0x1e0   : > { %v1282_v58 = vmax.f32 %v1234_v51, 0.0  ;;  %v1283_v62 = vmax.f32 %v1235_v55, 0.0 }
 0x1e1   : > { %v1124_v14 = vpop.permute.xlu1 %1123  ;;  %v1126_v41 = vpop.permute.xlu0 %1125 }
 0x1e2   : > { %2535 = vmatmul.mubr.msk.f32.gmra.mrb[30].mxu1 %vm1325_vm4, %v1280_v54  ;;  %v1236_v30 = vmax.f32 %v3413_v10, %v1124_v14  ;;  %v1237_v21 = vmax.f32 %v3420_v4, %v1126_v41  ;;  %v3644_v54 = vshrl.u32 %v4145_v23, 7  ;;  %v2567_v23 = vld [vmem:[%s4142_s5 + $0xb] ss:$0 sm:$0xff] }
 0x1e3   : > { %1702 = vmatprep.mubr.f32.mxu1 %v2883_v3 }
 0x1e4   : > { %v1284_v2 = vmax.f32 %v1236_v30, 0.0  ;;  %v1285_v5 = vmax.f32 %v1237_v21, 0.0  ;;  %v1321_v26 = vsub.s32 1, %v3644_v54 }
 0x1e5   : > { %v1128_v56 = vpop.permute.xlu1 %1127  ;;  %v1130_v60 = vpop.permute.xlu0 %1129 }
 0x1e6   : > { %2536 = vmatmul.mubr.msk.f32.gmra.mrb[32].mxu1 %vm1325_vm4, %v1281_v37  ;;  %v1238_v59 = vmax.f32 %v3423_v16, %v1128_v56  ;;  %v1239_v34 = vmax.f32 %v3430_v19, %v1130_v60 }
 0x1e7   : > { %1708 = vmatprep.mubr.f32.mxu1 %v2883_v3 }
 0x1e8   : > { %v1286_v10 = vmax.f32 %v1238_v59, 0.0  ;;  %v1287_v4 = vmax.f32 %v1239_v34, 0.0 }
 0x1e9   : > { %v1132_v45 = vpop.permute.xlu1 %1131  ;;  %v1134_v25 = vpop.permute.xlu0 %1133 }
 0x1ea   : > { %2537 = vmatmul.mubr.msk.f32.gmra.mrb[34].mxu1 %vm1325_vm4, %v1282_v58  ;;  %v1240_v17 = vmax.f32 %v3433_v24, %v1132_v45  ;;  %v1241_v7 = vmax.f32 %v3440_v27, %v1134_v25 }
 0x1eb   : > { %1714 = vmatprep.mubr.f32.mxu1 %v2883_v3 }
 0x1ec   : > { %v1288_v16 = vmax.f32 %v1240_v17, 0.0  ;;  %v1289_v19 = vmax.f32 %v1241_v7, 0.0 }
 0x1ed   : > { %v1136_v63 = vpop.permute.xlu1 %1135  ;;  %v1138_v49 = vpop.permute.xlu0 %1137 }
 0x1ee   : > { %2538 = vmatmul.mubr.msk.f32.gmra.mrb[36].mxu1 %vm1325_vm4, %v1283_v62  ;;  %v1242_v38 = vmax.f32 %v3443_v28, %v1136_v63  ;;  %v1243_v0 = vmax.f32 %v3450_v31, %v1138_v49 }
 0x1ef   : > { %1720 = vmatprep.mubr.f32.mxu1 %v2883_v3 }
 0x1f0   : > { %v1290_v24 = vmax.f32 %v1242_v38, 0.0  ;;  %v1291_v27 = vmax.f32 %v1243_v0, 0.0 }
 0x1f1   : > { %v1140_v6 = vpop.permute.xlu1 %1139  ;;  %v1142_v29 = vpop.permute.xlu0 %1141 }
 0x1f2   : > { %2539 = vmatmul.mubr.msk.f32.gmra.mrb[38].mxu1 %vm1325_vm4, %v1284_v2  ;;  %v1244_v18 = vmax.f32 %v3453_v32, %v1140_v6  ;;  %v1245_v42 = vmax.f32 %v3460_v35, %v1142_v29 }
 0x1f3   : > { %1726 = vmatprep.mubr.f32.mxu1 %v2883_v3 }
 0x1f4   : > { %v1292_v28 = vmax.f32 %v1244_v18, 0.0  ;;  %v1293_v31 = vmax.f32 %v1245_v42, 0.0 }
 0x1f5   : > { %v1144_v53 = vpop.permute.xlu1 %1143  ;;  %v1146_v8 = vpop.permute.xlu0 %1145 }
 0x1f6   : > { %2540 = vmatmul.mubr.msk.f32.gmra.mrb[40].mxu1 %vm1325_vm4, %v1285_v5  ;;  %v1246_v9 = vmax.f32 %v3463_v36, %v1144_v53  ;;  %v1247_v11 = vmax.f32 %v3470_v39, %v1146_v8  ;;  %v2556_v8 = vld [vmem:[%s4142_s5] ss:$0 sm:$0xff] }
 0x1f7   : > { %1732 = vmatprep.mubr.f32.mxu1 %v2883_v3 }
 0x1f8   : > { %v1294_v32 = vmax.f32 %v1246_v9, 0.0  ;;  %v1295_v35 = vmax.f32 %v1247_v11, 0.0 }
 0x1f9   : > { %v1148_v15 = vpop.permute.xlu1 %1147  ;;  %v1150_v57 = vpop.permute.xlu0 %1149 }
 0x1fa   : > { %2541 = vmatmul.mubr.msk.f32.gmra.mrb[42].mxu1 %vm1325_vm4, %v1286_v10  ;;  %v1248_v46 = vmax.f32 %v3473_v40, %v1148_v15  ;;  %v1249_v22 = vmax.f32 %v3480_v43, %v1150_v57 }
 0x1fb   : > { %1738 = vmatprep.mubr.f32.mxu1 %v2883_v3 }
 0x1fc   : > { %v1296_v36 = vmax.f32 %v1248_v46, 0.0  ;;  %v1297_v39 = vmax.f32 %v1249_v22, 0.0 }
 0x1fd   : > { %v1152_v33 = vpop.permute.xlu1 %1151  ;;  %v1154_v50 = vpop.permute.xlu0 %1153 }
 0x1fe   : > { %2542 = vmatmul.mubr.msk.f32.gmra.mrb[44].mxu1 %vm1325_vm4, %v1287_v4  ;;  %v1250_v12 = vmax.f32 %v3483_v44, %v1152_v33  ;;  %v1251_v61 = vmax.f32 %v3490_v47, %v1154_v50  ;;  %v1317_v47 = vsub.s32 0, %v3644_v54 }
 0x1ff   : > { %1744 = vmatprep.mubr.f32.mxu1 %v2883_v3 }
 0x200   : > { %v1298_v40 = vmax.f32 %v1250_v12, 0.0  ;;  %v1299_v43 = vmax.f32 %v1251_v61, 0.0 }
 0x201   : > { %v1156_v20 = vpop.permute.xlu1 %1155 }
 0x202   : > { %2543 = vmatmul.mubr.msk.f32.gmra.mrb[46].mxu1 %vm1325_vm4, %v1288_v16  ;;  %v1252_v13 = vmax.f32 %v3493_v48, %v1156_v20  ;;  %v3653_v48 = vrot.slane %v1313_v1, %v1317_v47  ;;  %v2352_v20 = vld [vmem:[#allocation2] sm:$0x1] }
 0x203   : > { %1750 = vmatprep.mubr.f32.mxu1 %v2883_v3 }
 0x204   : > { %v1300_v44 = vmax.f32 %v1252_v13, 0.0 }
 0x206   : > { %2544 = vmatmul.mubr.msk.f32.gmra.mrb[48].mxu1 %vm1325_vm4, %v1289_v19 }
 0x207   : > { %1756 = vmatprep.mubr.f32.mxu1 %v2883_v3 }
 0x20a   : > { %2545 = vmatmul.mubr.msk.f32.gmra.mrb[50].mxu1 %vm1325_vm4, %v1290_v24 }
 0x20b   : > { %1762 = vmatprep.mubr.f32.mxu1 %v2883_v3 }
 0x20e   : > { %2546 = vmatmul.mubr.msk.f32.gmra.mrb[52].mxu1 %vm1325_vm4, %v1291_v27 }
 0x20f   : > { %1768 = vmatprep.mubr.f32.mxu1 %v2883_v3 }
 0x212   : > { %2547 = vmatmul.mubr.msk.f32.gmra.mrb[54].mxu1 %vm1325_vm4, %v1292_v28 }
 0x213   : > { %1774 = vmatprep.mubr.f32.mxu1 %v2883_v3 }
 0x216   : > { %2548 = vmatmul.mubr.msk.f32.gmra.mrb[56].mxu1 %vm1325_vm4, %v1293_v31 }
 0x217   : > { %1780 = vmatprep.mubr.f32.mxu1 %v2883_v3 }
 0x21a   : > { %2549 = vmatmul.mubr.msk.f32.gmra.mrb[58].mxu1 %vm1325_vm4, %v1294_v32  ;;  %v2557_v32 = vld [vmem:[%s4142_s5 + $0x1] ss:$0 sm:$0xff] }
 0x21b   : > { %1786 = vmatprep.mubr.f32.mxu1 %v2883_v3 }
 0x21e   : > { %2550 = vmatmul.mubr.msk.f32.gmra.mrb[60].mxu1 %vm1325_vm4, %v1295_v35 }
 0x21f   : > { %1792 = vmatprep.mubr.f32.mxu1 %v2883_v3 }
 0x222   : > { %2551 = vmatmul.mubr.msk.f32.gmra.mrb[62].mxu1 %vm1325_vm4, %v1296_v36 }
 0x223   : > { %1798 = vmatprep.mubr.f32.mxu1 %v2883_v3 }
 0x226   : > { %2552 = vmatmul.mubr.msk.f32.gmra.mrb[64].mxu1 %vm1325_vm4, %v1297_v39 }
 0x227   : > { %1804 = vmatprep.mubr.f32.mxu1 %v2883_v3 }
 0x22a   : > { %2553 = vmatmul.mubr.msk.f32.gmra.mrb[66].mxu1 %vm1325_vm4, %v1298_v40 }
 0x22b   : > { %1810 = vmatprep.mubr.f32.mxu1 %v2883_v3 }
 0x22e   : > { %2554 = vmatmul.mubr.msk.f32.gmra.mrb[68].mxu1 %vm1325_vm4, %v1299_v43  ;;  %v2558_v43 = vld [vmem:[%s4142_s5 + $0x2] ss:$0 sm:$0xff] }
 0x22f   : > { %1816 = vmatprep.mubr.f32.mxu1 %v2883_v3  ;;  %v3655_v3 = vrot.slane %v1313_v1, %v1321_v26 }
 0x232   : > { %2555 = vmatmul.mubr.msk.f32.gmra.mrb[70].mxu1 %vm1325_vm4, %v1300_v44 }
 0x279   : > { %v1608_v37 = vpop.f32.mrb[0].mxu1 }
 0x27a   : > { %v3658_v51 = vadd.f32 %v1608_v37, %v3653_v48  ;;  %v1610_v52 = vpop.f32.mrb[1].mxu1 }
 0x27b   : > { %v3661_v58 = vadd.f32 %v1610_v52, %v3655_v3 }
 0x27d   : > { %v1835_v55 = vmax.f32 %v3658_v51, %v3661_v58  ;;  %v1614_v14 = vpop.f32.mrb[2].mxu1  ;;  %v2569_v51 = vld [vmem:[%s4142_s5 + $0xd] ss:$0 sm:$0xff] }
 0x27e   : > { %v3666_v62 = vadd.f32 %v1614_v14, %v3653_v48  ;;  %v1616_v30 = vpop.f32.mrb[3].mxu1 }
 0x27f   : > { %v3669_v41 = vadd.f32 %v1616_v30, %v3655_v3  ;;  %v2885_v30 = vmov 0  }
 0x280   : > { %2812 = vset.pattern.permute.xlu1 %v2885_v30  ;;  %2813 = vset.pattern.permute.xlu0 %v2885_v30 }
 0x281   : > { %v1836_v2 = vmax.f32 %v3666_v62, %v3669_v41  ;;  %v1620_v21 = vpop.f32.mrb[4].mxu1  ;;  %2355 = vperm.xlu1 %2812, %v2352_v20   ;;  %v2570_v41 = vld [vmem:[%s4142_s5 + $0xe] ss:$0 sm:$0xff] }
 0x282   : > { %v3674_v56 = vadd.f32 %v1620_v21, %v3653_v48  ;;  %v1622_v5 = vpop.f32.mrb[5].mxu1 }
 0x283   : > { %v3677_v59 = vadd.f32 %v1622_v5, %v3655_v3 }
 0x285   : > { %v1837_v60 = vmax.f32 %v3674_v56, %v3677_v59  ;;  %v1536_v10 = vpop.f32.mrb[48].mxu0  ;;  %v1626_v34 = vpop.f32.mrb[6].mxu1  ;;  %v2571_v56 = vld [vmem:[%s4142_s5 + $0xf] ss:$0 sm:$0xff] }
 0x286   : > { %v1537_v45 = vadd.f32 %v1536_v10, %v3653_v48  ;;  %v3683_v4 = vadd.f32 %v1626_v34, %v3653_v48  ;;  %v1538_v17 = vpop.f32.mrb[49].mxu0  ;;  %v1628_v25 = vpop.f32.mrb[7].mxu1 }
 0x287   : > { %v1539_v16 = vadd.f32 %v1538_v17, %v3655_v3  ;;  %v3687_v7 = vadd.f32 %v1628_v25, %v3655_v3  ;;  %v2559_v17 = vld [vmem:[%s4142_s5 + $0x3] ss:$0 sm:$0xff] }
 0x289   : > { %v1823_v63 = vmax.f32 %v1537_v45, %v1539_v16  ;;  %v1838_v19 = vmax.f32 %v3683_v4, %v3687_v7  ;;  %v1542_v38 = vpop.f32.mrb[50].mxu0  ;;  %v1632_v49 = vpop.f32.mrb[8].mxu1 }
 0x28a   : > { %v1543_v24 = vadd.f32 %v1542_v38, %v3653_v48  ;;  %v3693_v0 = vadd.f32 %v1632_v49, %v3653_v48  ;;  %v1544_v6 = vpop.f32.mrb[51].mxu0  ;;  %v1634_v27 = vpop.f32.mrb[9].mxu1 }
 0x28b   : > { %v1545_v18 = vadd.f32 %v1544_v6, %v3655_v3  ;;  %v3697_v29 = vadd.f32 %v1634_v27, %v3655_v3  ;;  %v1871_v28 = vmax.f32 %v1823_v63, 0.0 }
 0x28d   : > { %v1824_v42 = vmax.f32 %v1543_v24, %v1545_v18  ;;  %v1839_v53 = vmax.f32 %v3693_v0, %v3697_v29  ;;  %v1548_v31 = vpop.f32.mrb[52].mxu0  ;;  %v1638_v9 = vpop.f32.mrb[10].mxu1  ;;  %v2255_v33 = vmul.f32 %v2556_v8, %v1871_v28  ;;  %v2573_v0 = vld [vmem:[%s4142_s5 + $0x11] ss:$0 sm:$0xff] }
 0x28e   : > { %v1549_v11 = vadd.f32 %v1548_v31, %v3653_v48  ;;  %v3709_v15 = vadd.f32 %v1638_v9, %v3653_v48  ;;  %v1550_v35 = vpop.f32.mrb[53].mxu0  ;;  %v1640_v46 = vpop.f32.mrb[11].mxu1 }
 0x28f   : > { %v1872_v57 = vmax.f32 %v1824_v42, 0.0  ;;  %v1551_v36 = vadd.f32 %v1550_v35, %v3655_v3  ;;  %v3713_v22 = vadd.f32 %v1640_v46, %v3655_v3 }
 0x291   : > { %v2256_v39 = vmul.f32 %v2557_v32, %v1872_v57  ;;  %v1825_v12 = vmax.f32 %v1549_v11, %v1551_v36  ;;  %v1840_v50 = vmax.f32 %v3709_v15, %v3713_v22  ;;  %v1554_v40 = vpop.f32.mrb[54].mxu0  ;;  %v1644_v61 = vpop.f32.mrb[12].mxu1  ;;  %v2560_v32 = vld [vmem:[%s4142_s5 + $0x4] ss:$0 sm:$0xff] }
 0x292   : > { %v1555_v13 = vadd.f32 %v1554_v40, %v3653_v48  ;;  %v3722_v44 = vadd.f32 %v1644_v61, %v3653_v48  ;;  %v1556_v1 = vpop.f32.mrb[55].mxu0  ;;  %v1646_v26 = vpop.f32.mrb[13].mxu1 }
 0x293   : > { %v2303_v37 = vadd.f32 %v2256_v39, %v2255_v33  ;;  %v1873_v52 = vmax.f32 %v1825_v12, 0.0  ;;  %v1557_v14 = vadd.f32 %v1556_v1, %v3655_v3  ;;  %v3726_v21 = vadd.f32 %v1646_v26, %v3655_v3 }
 0x295   : > { %v2257_v5 = vmul.f32 %v2558_v43, %v1873_v52  ;;  %v1826_v10 = vmax.f32 %v1555_v13, %v1557_v14  ;;  %v1560_v34 = vpop.f32.mrb[56].mxu0  ;;  %v1650_v45 = vpop.f32.mrb[14].mxu1  ;;  %v1841_v25 = vmax.f32 %v3722_v44, %v3726_v21  ;;  %v2561_v13 = vld [vmem:[%s4142_s5 + $0x5] ss:$0 sm:$0xff]  ;;  %v2575_v44 = vld [vmem:[%s4142_s5 + $0x13] ss:$0 sm:$0xff] }
 0x296   : > { %v1561_v16 = vadd.f32 %v1560_v34, %v3653_v48  ;;  %v3735_v63 = vadd.f32 %v1650_v45, %v3653_v48  ;;  %v1562_v38 = vpop.f32.mrb[57].mxu0  ;;  %v1652_v49 = vpop.f32.mrb[15].mxu1 }
 0x297   : > { %v2304_v24 = vadd.f32 %v2303_v37, %v2257_v5  ;;  %v1874_v6 = vmax.f32 %v1826_v10, 0.0  ;;  %v1563_v27 = vadd.f32 %v1562_v38, %v3655_v3  ;;  %v3739_v18 = vadd.f32 %v1652_v49, %v3655_v3 }
 0x299   : > { %v2258_v28 = vmul.f32 %v2559_v17, %v1874_v6  ;;  %v1827_v42 = vmax.f32 %v1561_v16, %v1563_v27  ;;  %v1842_v31 = vmax.f32 %v3735_v63, %v3739_v18  ;;  %v1566_v9 = vpop.f32.mrb[58].mxu0  ;;  %v1656_v8 = vpop.f32.mrb[16].mxu1 }
 0x29a   : > { %v1567_v11 = vadd.f32 %v1566_v9, %v3653_v48  ;;  %v3748_v35 = vadd.f32 %v1656_v8, %v3653_v48  ;;  %v1568_v46 = vpop.f32.mrb[59].mxu0  ;;  %v1658_v57 = vpop.f32.mrb[17].mxu1 }
 0x29b   : > { %v2305_v36 = vadd.f32 %v2304_v24, %v2258_v28  ;;  %v1875_v33 = vmax.f32 %v1827_v42, 0.0  ;;  %v1569_v39 = vadd.f32 %v1568_v46, %v3655_v3  ;;  %v3752_v12 = vadd.f32 %v1658_v57, %v3655_v3  ;;  %v2562_v24 = vld [vmem:[%s4142_s5 + $0x6] ss:$0 sm:$0xff] }
 0x29d   : > { %v2259_v40 = vmul.f32 %v2560_v32, %v1875_v33  ;;  %v1828_v61 = vmax.f32 %v1567_v11, %v1569_v39  ;;  %v1572_v20 = vpop.f32.mrb[60].mxu0  ;;  %v1662_v43 = vpop.f32.mrb[18].mxu1  ;;  %v1843_v1 = vmax.f32 %v3748_v35, %v3752_v12  ;;  %v2563_v39 = vld [vmem:[%s4142_s5 + $0x7] ss:$0 sm:$0xff]  ;;  %v2577_v35 = vld [vmem:[%s4142_s5 + $0x15] ss:$0 sm:$0xff] }
 0x29e   : > { %v1573_v26 = vadd.f32 %v1572_v20, %v3653_v48  ;;  %v3761_v37 = vadd.f32 %v1662_v43, %v3653_v48  ;;  %v1574_v52 = vpop.f32.mrb[61].mxu0  ;;  %v1664_v14 = vpop.f32.mrb[19].mxu1 }
 0x29f   : > { %v2306_v30 = vadd.f32 %v2305_v36, %v2259_v40  ;;  %v1876_v5 = vmax.f32 %v1828_v61, 0.0  ;;  %v1575_v10 = vadd.f32 %v1574_v52, %v3655_v3  ;;  %v3765_v34 = vadd.f32 %v1664_v14, %v3655_v3 }
 0x2a1   : > { %v2260_v45 = vmul.f32 %v2561_v13, %v1876_v5  ;;  %v1829_v17 = vmax.f32 %v1573_v26, %v1575_v10  ;;  %v1844_v16 = vmax.f32 %v3761_v37, %v3765_v34  ;;  %v1578_v38 = vpop.f32.mrb[62].mxu0  ;;  %v1668_v49 = vpop.f32.mrb[20].mxu1 }
 0x2a2   : > { %v1579_v6 = vadd.f32 %v1578_v38, %v3653_v48  ;;  %v3774_v27 = vadd.f32 %v1668_v49, %v3653_v48  ;;  %v1580_v28 = vpop.f32.mrb[63].mxu0  ;;  %v1670_v42 = vpop.f32.mrb[21].mxu1  ;;  %v2564_v49 = vld [vmem:[%s4142_s5 + $0x8] ss:$0 sm:$0xff] }
 0x2a3   : > { %v2307_v9 = vadd.f32 %v2306_v30, %v2260_v45  ;;  %v1877_v8 = vmax.f32 %v1829_v17, 0.0  ;;  %v1581_v32 = vadd.f32 %v1580_v28, %v3655_v3  ;;  %v3778_v11 = vadd.f32 %v1670_v42, %v3655_v3 }
 0x2a5   : > { %v2261_v46 = vmul.f32 %v2562_v24, %v1877_v8  ;;  %v1830_v57 = vmax.f32 %v1579_v6, %v1581_v32  ;;  %v1584_v36 = vpop.f32.mrb[64].mxu0  ;;  %v1674_v33 = vpop.f32.mrb[22].mxu1  ;;  %v1845_v40 = vmax.f32 %v3774_v27, %v3778_v11  ;;  %v2579_v27 = vld [vmem:[%s4142_s5 + $0x17] ss:$0 sm:$0xff] }
 0x2a6   : > { %v1585_v61 = vadd.f32 %v1584_v36, %v3653_v48  ;;  %v3787_v20 = vadd.f32 %v1674_v33, %v3653_v48  ;;  %v1586_v43 = vpop.f32.mrb[65].mxu0  ;;  %v1676_v13 = vpop.f32.mrb[23].mxu1 }
 0x2a7   : > { %v2308_v26 = vadd.f32 %v2307_v9, %v2261_v46  ;;  %v1878_v52 = vmax.f32 %v1830_v57, 0.0  ;;  %v1587_v14 = vadd.f32 %v1586_v43, %v3655_v3  ;;  %v3791_v30 = vadd.f32 %v1676_v13, %v3655_v3 }
 0x2a9   : > { %v2262_v5 = vmul.f32 %v2563_v39, %v1878_v52  ;;  %v1831_v10 = vmax.f32 %v1585_v61, %v1587_v14  ;;  %v1846_v45 = vmax.f32 %v3787_v20, %v3791_v30  ;;  %v1590_v17 = vpop.f32.mrb[66].mxu0  ;;  %v1680_v38 = vpop.f32.mrb[24].mxu1  ;;  %v2565_v61 = vld [vmem:[%s4142_s5 + $0x9] ss:$0 sm:$0xff]  ;;  %v2580_v30 = vld [vmem:[%s4142_s5 + $0x18] ss:$0 sm:$0xff] }
 0x2aa   : > { %v1591_v24 = vadd.f32 %v1590_v17, %v3653_v48  ;;  %v3800_v6 = vadd.f32 %v1680_v38, %v3653_v48  ;;  %v1592_v28 = vpop.f32.mrb[67].mxu0  ;;  %v1682_v42 = vpop.f32.mrb[25].mxu1 }
 0x2ab   : > { %v2309_v9 = vadd.f32 %v2308_v26, %v2262_v5  ;;  %v1879_v8 = vmax.f32 %v1831_v10, 0.0  ;;  %v1593_v32 = vadd.f32 %v1592_v28, %v3655_v3  ;;  %v3804_v46 = vadd.f32 %v1682_v42, %v3655_v3 }
 0x2ad   : > { %v2263_v57 = vmul.f32 %v2564_v49, %v1879_v8  ;;  %v1832_v36 = vmax.f32 %v1591_v24, %v1593_v32  ;;  %v1596_v33 = vpop.f32.mrb[68].mxu0  ;;  %v1686_v39 = vpop.f32.mrb[26].mxu1  ;;  %v1847_v43 = vmax.f32 %v3800_v6, %v3804_v46  ;;  %v2566_v32 = vld [vmem:[%s4142_s5 + $0xa] ss:$0 sm:$0xff]  ;;  %v2581_v6 = vld [vmem:[%s4142_s5 + $0x19] ss:$0 sm:$0xff] }
 0x2ae   : > { %v1597_v13 = vadd.f32 %v1596_v33, %v3653_v48  ;;  %v3813_v26 = vadd.f32 %v1686_v39, %v3653_v48  ;;  %v1598_v52 = vpop.f32.mrb[69].mxu0  ;;  %v1688_v14 = vpop.f32.mrb[27].mxu1 }
 0x2af   : > { %v2310_v5 = vadd.f32 %v2309_v9, %v2263_v57  ;;  %v1880_v10 = vmax.f32 %v1832_v36, 0.0  ;;  %v1599_v17 = vadd.f32 %v1598_v52, %v3655_v3  ;;  %v3817_v38 = vadd.f32 %v1688_v14, %v3655_v3 }
 0x2b1   : > { %v2264_v49 = vmul.f32 %v2565_v61, %v1880_v10  ;;  %v1833_v24 = vmax.f32 %v1597_v13, %v1599_v17  ;;  %v1848_v28 = vmax.f32 %v3813_v26, %v3817_v38  ;;  %v1602_v42 = vpop.f32.mrb[70].mxu0  ;;  %v1692_v8 = vpop.f32.mrb[28].mxu1  ;;  %v2582_v26 = vld [vmem:[%s4142_s5 + $0x1a] ss:$0 sm:$0xff] }
 0x2b2   : > { %v1603_v33 = vadd.f32 %v1602_v42, %v3653_v48  ;;  %v3826_v9 = vadd.f32 %v1692_v8, %v3653_v48  ;;  %v1604_v57 = vpop.f32.mrb[71].mxu0  ;;  %v1694_v36 = vpop.f32.mrb[29].mxu1 }
 0x2b3   : > { %v2311_v39 = vadd.f32 %v2310_v5, %v2264_v49  ;;  %v1881_v52 = vmax.f32 %v1833_v24, 0.0  ;;  %v1605_v61 = vadd.f32 %v1604_v57, %v3655_v3  ;;  %v3830_v13 = vadd.f32 %v1694_v36, %v3655_v3 }
 0x2b4   : > { %v1883_v49 = vmax.f32 %v1835_v55, 0.0  ;;  %v1884_v36 = vmax.f32 %v1836_v2, 0.0 }
 0x2b5   : > { %v2265_v14 = vmul.f32 %v2566_v32, %v1881_v52  ;;  %v1834_v10 = vmax.f32 %v1603_v33, %v1605_v61  ;;  %v1698_v17 = vpop.f32.mrb[30].mxu1  ;;  %v1849_v42 = vmax.f32 %v3826_v9, %v3830_v13  ;;  %v2568_v33 = vld [vmem:[%s4142_s5 + $0xc] ss:$0 sm:$0xff]  ;;  %v2583_v9 = vld [vmem:[%s4142_s5 + $0x1b] ss:$0 sm:$0xff] }
 0x2b6   : > { %v3838_v8 = vadd.f32 %v1698_v17, %v3653_v48  ;;  %v1700_v5 = vpop.f32.mrb[31].mxu1  ;;  %v2268_v2 = vmul.f32 %v2569_v51, %v1884_v36 }
 0x2b7   : > { %v2312_v24 = vadd.f32 %v2311_v39, %v2265_v14  ;;  %v1882_v57 = vmax.f32 %v1834_v10, 0.0  ;;  %v3844_v32 = vadd.f32 %v1700_v5, %v3655_v3  ;;  %v2267_v39 = vmul.f32 %v2568_v33, %v1883_v49 }
 0x2b8   : > { %v1885_v14 = vmax.f32 %v1837_v60, 0.0  ;;  %v1886_v10 = vmax.f32 %v1838_v19, 0.0  ;;  %v1887_v33 = vmax.f32 %v1839_v53, 0.0  ;;  %v2572_v19 = vld [vmem:[%s4142_s5 + $0x10] ss:$0 sm:$0xff] }
 0x2b9   : > { %v2266_v52 = vmul.f32 %v2567_v23, %v1882_v57  ;;  %v1850_v61 = vmax.f32 %v3838_v8, %v3844_v32  ;;  %v1704_v17 = vpop.f32.mrb[32].mxu1  ;;  %v2584_v8 = vld [vmem:[%s4142_s5 + $0x1c] ss:$0 sm:$0xff] }
 0x2ba   : > { %v3858_v58 = vadd.f32 %v1704_v17, %v3653_v48  ;;  %v1706_v55 = vpop.f32.mrb[33].mxu1  ;;  %v2270_v36 = vmul.f32 %v2571_v56, %v1886_v10  ;;  %v1891_v56 = vmax.f32 %v1843_v1, 0.0 }
 0x2bb   : > { %v2313_v62 = vadd.f32 %v2312_v24, %v2266_v52  ;;  %v3864_v23 = vadd.f32 %v1706_v55, %v3655_v3  ;;  %v2269_v24 = vmul.f32 %v2570_v41, %v1885_v14  ;;  %v1888_v52 = vmax.f32 %v1840_v50, 0.0  ;;  %v2574_v50 = vld [vmem:[%s4142_s5 + $0x12] ss:$0 sm:$0xff] }
 0x2bc   : > { %v1889_v14 = vmax.f32 %v1841_v25, 0.0  ;;  %v1890_v41 = vmax.f32 %v1842_v31, 0.0  ;;  %v2576_v31 = vld [vmem:[%s4142_s5 + $0x14] ss:$0 sm:$0xff] }
 0x2bd   : > { %v2314_v5 = vadd.f32 %v2313_v62, %v2267_v39  ;;  %v1851_v49 = vmax.f32 %v3858_v58, %v3864_v23  ;;  %v1710_v57 = vpop.f32.mrb[34].mxu1  ;;  %v2271_v39 = vmul.f32 %v2572_v19, %v1887_v33  ;;  %v2272_v62 = vmul.f32 %v2573_v0, %v1888_v52 }
 0x2be   : > { %v3878_v59 = vadd.f32 %v1710_v57, %v3653_v48  ;;  %v1712_v60 = vpop.f32.mrb[35].mxu1  ;;  %v2273_v57 = vmul.f32 %v2574_v50, %v1889_v14  ;;  %v1893_v52 = vmax.f32 %v1845_v40, 0.0 }
 0x2bf   : > { %v2315_v4 = vadd.f32 %v2314_v5, %v2268_v2  ;;  %v3884_v7 = vadd.f32 %v1712_v60, %v3655_v3  ;;  %v2274_v60 = vmul.f32 %v2575_v44, %v1890_v41 }
 0x2c1   : > { %v2316_v17 = vadd.f32 %v2315_v4, %v2269_v24  ;;  %v1852_v51 = vmax.f32 %v3878_v59, %v3884_v7  ;;  %v1716_v55 = vpop.f32.mrb[36].mxu1  ;;  %v1892_v24 = vmax.f32 %v1844_v16, 0.0  ;;  %v2578_v16 = vld [vmem:[%s4142_s5 + $0x16] ss:$0 sm:$0xff]  ;;  %v2586_v59 = vld [vmem:[%s4142_s5 + $0x1e] ss:$0 sm:$0xff] }
 0x2c2   : > { %v3898_v29 = vadd.f32 %v1716_v55, %v3653_v48  ;;  %v1718_v53 = vpop.f32.mrb[37].mxu1  ;;  %v1894_v55 = vmax.f32 %v1846_v45, 0.0  ;;  %v2277_v14 = vmul.f32 %v2578_v16, %v1893_v52  ;;  %v2585_v52 = vld [vmem:[%s4142_s5 + $0x1d] ss:$0 sm:$0xff] }
 0x2c3   : > { %v2317_v15 = vadd.f32 %v2316_v17, %v2270_v36  ;;  %v3904_v22 = vadd.f32 %v1718_v53, %v3655_v3  ;;  %v2275_v36 = vmul.f32 %v2576_v31, %v1891_v56  ;;  %v2276_v17 = vmul.f32 %v2577_v35, %v1892_v24 }
 0x2c4   : > { %v2278_v45 = vmul.f32 %v2579_v27, %v1894_v55 }
 0x2c5   : > { %v2318_v2 = vadd.f32 %v2317_v15, %v2271_v39  ;;  %v1853_v10 = vmax.f32 %v3898_v29, %v3904_v22  ;;  %v1722_v5 = vpop.f32.mrb[38].mxu1  ;;  %v1895_v15 = vmax.f32 %v1847_v43, 0.0 }
 0x2c6   : > { %v3918_v21 = vadd.f32 %v1722_v5, %v3653_v48  ;;  %v1724_v25 = vpop.f32.mrb[39].mxu1 }
 0x2c7   : > { %v2319_v63 = vadd.f32 %v2318_v2, %v2272_v62  ;;  %v3924_v18 = vadd.f32 %v1724_v25, %v3655_v3  ;;  %v1896_v62 = vmax.f32 %v1848_v28, 0.0  ;;  %v2279_v44 = vmul.f32 %v2580_v30, %v1895_v15 }
 0x2c8   : > { %v1897_v25 = vmax.f32 %v1849_v42, 0.0 }
 0x2c9   : > { %v2320_v33 = vadd.f32 %v2319_v63, %v2273_v57  ;;  %v1854_v4 = vmax.f32 %v3918_v21, %v3924_v18  ;;  %v1728_v19 = vpop.f32.mrb[40].mxu1  ;;  %v2280_v38 = vmul.f32 %v2581_v6, %v1896_v62  ;;  %v1898_v63 = vmax.f32 %v1850_v61, 0.0  ;;  %v2590_v6 = vld [vmem:[%s4142_s5 + $0x22] ss:$0 sm:$0xff] }
 0x2ca   : > { %v3938_v12 = vadd.f32 %v1728_v19, %v3653_v48  ;;  %v1730_v1 = vpop.f32.mrb[41].mxu1  ;;  %v2281_v24 = vmul.f32 %v2582_v26, %v1897_v25  ;;  %v1899_v19 = vmax.f32 %v1851_v49, 0.0 }
 0x2cb   : > { %v2321_v37 = vadd.f32 %v2320_v33, %v2274_v60  ;;  %v3944_v34 = vadd.f32 %v1730_v1, %v3655_v3  ;;  %v2282_v61 = vmul.f32 %v2583_v9, %v1898_v63 }
 0x2cd   : > { %v2322_v0 = vadd.f32 %v2321_v37, %v2275_v36  ;;  %v1855_v53 = vmax.f32 %v3938_v12, %v3944_v34  ;;  %v1734_v39 = vpop.f32.mrb[42].mxu1  ;;  %v1900_v12 = vmax.f32 %v1852_v51, 0.0  ;;  %v2283_v37 = vmul.f32 %v2584_v8, %v1899_v19  ;;  %v2593_v19 = vld [vmem:[%s4142_s5 + $0x25] ss:$0 sm:$0xff] }
 0x2ce   : > { %v1735_v11 = vadd.f32 %v1734_v39, %v3653_v48  ;;  %v1736_v40 = vpop.f32.mrb[43].mxu1  ;;  %v1901_v34 = vmax.f32 %v1853_v10, 0.0  ;;  %v2587_v39 = vld [vmem:[%s4142_s5 + $0x1f] ss:$0 sm:$0xff] }
 0x2cf   : > { %v2323_v50 = vadd.f32 %v2322_v0, %v2276_v17  ;;  %v1737_v20 = vadd.f32 %v1736_v40, %v3655_v3  ;;  %v2284_v51 = vmul.f32 %v2585_v52, %v1900_v12  ;;  %v1902_v17 = vmax.f32 %v1854_v4, 0.0 }
 0x2d0   : > { %v2285_v27 = vmul.f32 %v2586_v59, %v1901_v34  ;;  %v2595_v34 = vld [vmem:[%s4142_s5 + $0x27] ss:$0 sm:$0xff] }
 0x2d1   : > { %v2324_v41 = vadd.f32 %v2323_v50, %v2277_v14  ;;  %v1856_v2 = vmax.f32 %v1735_v11, %v1737_v20  ;;  %v1740_v5 = vpop.f32.mrb[44].mxu1  ;;  %v1903_v11 = vmax.f32 %v1855_v53, 0.0  ;;  %v2588_v14 = vld [vmem:[%s4142_s5 + $0x20] ss:$0 sm:$0xff]  ;;  %v2286_v18 = vmul.f32 %v2587_v39, %v1902_v17  ;;  %v2589_v20 = vld [vmem:[%s4142_s5 + $0x21] ss:$0 sm:$0xff] }
 0x2d2   : > { %v1741_v46 = vadd.f32 %v1740_v5, %v3653_v48  ;;  %v1742_v43 = vpop.f32.mrb[45].mxu1 }
 0x2d3   : > { %v2325_v57 = vadd.f32 %v2324_v41, %v2278_v45  ;;  %v1743_v56 = vadd.f32 %v1742_v43, %v3655_v3  ;;  %v1904_v4 = vmax.f32 %v1856_v2, 0.0  ;;  %v2287_v53 = vmul.f32 %v2588_v14, %v1903_v11 }
 0x2d5   : > { %v2326_v28 = vadd.f32 %v2325_v57, %v2279_v44  ;;  %v1857_v31 = vmax.f32 %v1741_v46, %v1743_v56  ;;  %v1746_v60 = vpop.f32.mrb[46].mxu1  ;;  %v2288_v2 = vmul.f32 %v2589_v20, %v1904_v4  ;;  %v2591_v57 = vld [vmem:[%s4142_s5 + $0x23] ss:$0 sm:$0xff] }
 0x2d6   : > { %v1747_v13 = vadd.f32 %v1746_v60, %v3653_v48  ;;  %v1748_v42 = vpop.f32.mrb[47].mxu1  ;;  %v2592_v60 = vld [vmem:[%s4142_s5 + $0x24] ss:$0 sm:$0xff] }
 0x2d7   : > { %v2327_v33 = vadd.f32 %v2326_v28, %v2280_v38  ;;  %v1749_v35 = vadd.f32 %v1748_v42, %v3655_v3  ;;  %v1905_v41 = vmax.f32 %v1857_v31, 0.0 }
 0x2d9   : > { %v2328_v32 = vadd.f32 %v2327_v33, %v2281_v24  ;;  %v1858_v1 = vmax.f32 %v1747_v13, %v1749_v35  ;;  %v1752_v36 = vpop.f32.mrb[48].mxu1  ;;  %v2289_v28 = vmul.f32 %v2590_v6, %v1905_v41 }
 0x2da   : > { %v1753_v58 = vadd.f32 %v1752_v36, %v3653_v48  ;;  %v1754_v23 = vpop.f32.mrb[49].mxu1  ;;  %v2594_v36 = vld [vmem:[%s4142_s5 + $0x26] ss:$0 sm:$0xff] }
 0x2db   : > { %v2329_v49 = vadd.f32 %v2328_v32, %v2282_v61  ;;  %v1755_v16 = vadd.f32 %v1754_v23, %v3655_v3  ;;  %v1906_v43 = vmax.f32 %v1858_v1, 0.0 }
 0x2dd   : > { %v2330_v7 = vadd.f32 %v2329_v49, %v2283_v37  ;;  %v1859_v55 = vmax.f32 %v1753_v58, %v1755_v16  ;;  %v1758_v0 = vpop.f32.mrb[50].mxu1  ;;  %v2290_v13 = vmul.f32 %v2591_v57, %v1906_v43 }
 0x2de   : > { %v1759_v29 = vadd.f32 %v1758_v0, %v3653_v48  ;;  %v1760_v22 = vpop.f32.mrb[51].mxu1  ;;  %v2596_v0 = vld [vmem:[%s4142_s5 + $0x28] ss:$0 sm:$0xff] }
 0x2df   : > { %v2331_v10 = vadd.f32 %v2330_v7, %v2284_v51  ;;  %v1761_v40 = vadd.f32 %v1760_v22, %v3655_v3  ;;  %v1907_v63 = vmax.f32 %v1859_v55, 0.0 }
 0x2e1   : > { %v2332_v21 = vadd.f32 %v2331_v10, %v2285_v27  ;;  %v1860_v15 = vmax.f32 %v1759_v29, %v1761_v40  ;;  %v1764_v50 = vpop.f32.mrb[52].mxu1  ;;  %v2291_v61 = vmul.f32 %v2592_v60, %v1907_v63  ;;  %v2597_v27 = vld [vmem:[%s4142_s5 + $0x29] ss:$0 sm:$0xff]  ;;  %v2600_v60 = vld [vmem:[%s4142_s5 + $0x2c] ss:$0 sm:$0xff] }
 0x2e2   : > { %v1765_v30 = vadd.f32 %v1764_v50, %v3653_v48  ;;  %v1766_v45 = vpop.f32.mrb[53].mxu1 }
 0x2e3   : > { %v2333_v62 = vadd.f32 %v2332_v21, %v2286_v18  ;;  %v1767_v5 = vadd.f32 %v1766_v45, %v3655_v3  ;;  %v1908_v42 = vmax.f32 %v1860_v15, 0.0  ;;  %v2598_v45 = vld [vmem:[%s4142_s5 + $0x2a] ss:$0 sm:$0xff] }
 0x2e5   : > { %v2334_v46 = vadd.f32 %v2333_v62, %v2287_v53  ;;  %v1861_v44 = vmax.f32 %v1765_v30, %v1767_v5  ;;  %v1770_v25 = vpop.f32.mrb[54].mxu1  ;;  %v2292_v58 = vmul.f32 %v2593_v19, %v1908_v42 }
 0x2e6   : > { %v1771_v56 = vadd.f32 %v1770_v25, %v3653_v48  ;;  %v1772_v26 = vpop.f32.mrb[55].mxu1 }
 0x2e7   : > { %v2335_v38 = vadd.f32 %v2334_v46, %v2288_v2  ;;  %v1773_v31 = vadd.f32 %v1772_v26, %v3655_v3  ;;  %v1909_v12 = vmax.f32 %v1861_v44, 0.0  ;;  %v2599_v44 = vld [vmem:[%s4142_s5 + $0x2b] ss:$0 sm:$0xff] }
 0x2e9   : > { %v2336_v9 = vadd.f32 %v2335_v38, %v2289_v28  ;;  %v1862_v24 = vmax.f32 %v1771_v56, %v1773_v31  ;;  %v1776_v33 = vpop.f32.mrb[56].mxu1  ;;  %v2293_v51 = vmul.f32 %v2594_v36, %v1909_v12 }
 0x2ea   : > { %v1777_v35 = vadd.f32 %v1776_v33, %v3653_v48  ;;  %v1778_v8 = vpop.f32.mrb[57].mxu1 }
 0x2eb   : > { %v2337_v32 = vadd.f32 %v2336_v9, %v2290_v13  ;;  %v1779_v1 = vadd.f32 %v1778_v8, %v3655_v3  ;;  %v1910_v23 = vmax.f32 %v1862_v24, 0.0 }
 0x2ed   : > { %v2338_v52 = vadd.f32 %v2337_v32, %v2291_v61  ;;  %v1863_v49 = vmax.f32 %v1777_v35, %v1779_v1  ;;  %v1782_v37 = vpop.f32.mrb[58].mxu1  ;;  %v2294_v29 = vmul.f32 %v2595_v34, %v1910_v23  ;;  %v2601_v32 = vld [vmem:[%s4142_s5 + $0x2d] ss:$0 sm:$0xff] }
 0x2ee   : > { %v1783_v16 = vadd.f32 %v1782_v37, %v3653_v48  ;;  %v1784_v59 = vpop.f32.mrb[59].mxu1  ;;  %v2602_v37 = vld [vmem:[%s4142_s5 + $0x2e] ss:$0 sm:$0xff] }
 0x2ef   : > { %v2339_v7 = vadd.f32 %v2338_v52, %v2292_v58  ;;  %v1911_v17 = vmax.f32 %v1863_v49, 0.0  ;;  %v1785_v55 = vadd.f32 %v1784_v59, %v3655_v3 }
 0x2f1   : > { %v2340_v39 = vadd.f32 %v2339_v7, %v2293_v51  ;;  %v1864_v22 = vmax.f32 %v1783_v16, %v1785_v55  ;;  %v1788_v10 = vpop.f32.mrb[60].mxu1  ;;  %v2295_v21 = vmul.f32 %v2596_v0, %v1911_v17  ;;  %v2603_v0 = vld [vmem:[%s4142_s5 + $0x2f] ss:$0 sm:$0xff] }
 0x2f2   : > { %v1789_v11 = vadd.f32 %v1788_v10, %v3653_v48  ;;  %v1790_v40 = vpop.f32.mrb[61].mxu1 }
 0x2f3   : > { %v2341_v14 = vadd.f32 %v2340_v39, %v2294_v29  ;;  %v1912_v18 = vmax.f32 %v1864_v22, 0.0  ;;  %v1791_v4 = vadd.f32 %v1790_v40, %v3655_v3 }
 0x2f5   : > { %v2342_v15 = vadd.f32 %v2341_v14, %v2295_v21  ;;  %v2296_v50 = vmul.f32 %v2597_v27, %v1912_v18  ;;  %v1865_v20 = vmax.f32 %v1789_v11, %v1791_v4  ;;  %v1794_v30 = vpop.f32.mrb[62].mxu1  ;;  %v4148_v4 = vlaneseq }
 0x2f6   : > { %v1795_v62 = vadd.f32 %v1794_v30, %v3653_v48  ;;  %v1796_v53 = vpop.f32.mrb[63].mxu1 }
 0x2f7   : > { %v2343_v41 = vadd.f32 %v2342_v15, %v2296_v50  ;;  %v1913_v5 = vmax.f32 %v1865_v20, 0.0  ;;  %v1797_v6 = vadd.f32 %v1796_v53, %v3655_v3  ;;  %v2371_v15 = vand.u32 127, %v4148_v4 }
 0x2f9   : > { %v2297_v46 = vmul.f32 %v2598_v45, %v1913_v5  ;;  %v1866_v2 = vmax.f32 %v1795_v62, %v1797_v6  ;;  %v1800_v43 = vpop.f32.mrb[64].mxu1  ;;  %v2374_v50 = vsub.s32 %v2371_v15, %v3644_v54 }
 0x2fa   : > { %v1801_v25 = vadd.f32 %v1800_v43, %v3653_v48  ;;  %v1802_v57 = vpop.f32.mrb[65].mxu1 }
 0x2fb   : > { %v2344_v56 = vadd.f32 %v2343_v41, %v2297_v46  ;;  %v1914_v26 = vmax.f32 %v1866_v2, 0.0  ;;  %v1803_v38 = vadd.f32 %v1802_v57, %v3655_v3 }
 0x2fd   : > { %v2298_v28 = vmul.f32 %v2599_v44, %v1914_v26  ;;  %v1867_v63 = vmax.f32 %v1801_v25, %v1803_v38  ;;  %v1806_v31 = vpop.f32.mrb[66].mxu1 }
 0x2fe   : > { %v1807_v9 = vadd.f32 %v1806_v31, %v3653_v48  ;;  %v1808_v13 = vpop.f32.mrb[67].mxu1 }
 0x2ff   : > { %v2345_v42 = vadd.f32 %v2344_v56, %v2298_v28  ;;  %v1915_v24 = vmax.f32 %v1867_v63, 0.0  ;;  %v1809_v33 = vadd.f32 %v1808_v13, %v3655_v3 }
 0x300   : > { %v2356_v27 = vpop.permute.xlu1 %2355 }
 0x301   : > { %v2299_v19 = vmul.f32 %v2600_v60, %v1915_v24  ;;  %v1868_v35 = vmax.f32 %v1807_v9, %v1809_v33  ;;  %v1812_v8 = vpop.f32.mrb[68].mxu1 }
 0x302   : > { %v1813_v61 = vadd.f32 %v1812_v8, %v3653_v48  ;;  %v1814_v12 = vpop.f32.mrb[69].mxu1 }
 0x303   : > { %v2346_v1 = vadd.f32 %v2345_v42, %v2299_v19  ;;  %v1916_v36 = vmax.f32 %v1868_v35, 0.0  ;;  %v1815_v52 = vadd.f32 %v1814_v12, %v3655_v3 }
 0x305   : > { %v2300_v58 = vmul.f32 %v2601_v32, %v1916_v36  ;;  %v1869_v23 = vmax.f32 %v1813_v61, %v1815_v52  ;;  %v1818_v49 = vpop.f32.mrb[70].mxu1 }
 0x306   : > { %v1819_v34 = vadd.f32 %v1818_v49, %v3653_v48  ;;  %v1820_v16 = vpop.f32.mrb[71].mxu1  ;;  %v2361_v48 = vrot.slane %v2356_v27, %v1317_v47 }
 0x307   : > { %v1917_v59 = vmax.f32 %v1869_v23, 0.0  ;;  %v1821_v7 = vadd.f32 %v1820_v16, %v3655_v3  ;;  %v2347_v51 = vadd.f32 %v2346_v1, %v2300_v58 }
 0x309   : > { %v2301_v17 = vmul.f32 %v2602_v37, %v1917_v59  ;;  %v1870_v55 = vmax.f32 %v1819_v34, %v1821_v7 }
 0x30b   : > { %v1918_v39 = vmax.f32 %v1870_v55, 0.0  ;;  %v2348_v29 = vadd.f32 %v2347_v51, %v2301_v17 }
 0x30d   : > { %v2302_v22 = vmul.f32 %v2603_v0, %v1918_v39 }
 0x30f   : > { %v2349_v10 = vadd.f32 %v2348_v29, %v2302_v22 }
 0x311   : > { %2350 = vadd.xlane.f32.xlu0 %v2349_v10 }
 0x39e   : > { %v2351_v11 = vpop.xlane.xlu0 %2350 }
 0x39f   : > { %v2362_v3 = vadd.f32 %v2361_v48, %v2351_v11 }
 0x3a1   : > { %v2363_v40 = vsub.f32 0.0, %v2362_v3 }
 0x3a3   : > { %v2364_v14 = vmul.f32 1.442695, %v2363_v40 }
 0x3a5   : > { %2814 = vpow2.f32 %v2364_v14 }
 0x3af   : > { %v2815_v21 = vpop.eup %2814 }
 0x3b0   : > { %v2366_v18 = vadd.f32 1.0, %v2815_v21 }
 0x3b2   : > { %2816 = vrcp.f32 %v2366_v18 }
 0x3bc   : > { %v2817_v20 = vpop.eup %2816 }
 0x3bd   : > { %v2375_v47 = vrot.slane %v2817_v20, %v2374_v50 }
 0x3bf   : > { %2378 = vst.msk [vmem:[%s499_s17] sm:$0x1] %vm2377_vm5, %v2375_v47 }
 0x3c0   : > { %2831 = shalt.err (!%p2828_p5)
}
 0x3c1   : > { %s2832_s9 = scalar_lea.hbm %s4093_s21, 16  ;;  %s2836_s14 = scalar_lea.hbm %s4144_s7, 32 }
 0x3c2   : > { %p2833_p7 = scmp.ne.s32.totalorder %s4093_s21, %s2832_s9  ;;  %p2837_p12 = scmp.lt.u32.totalorder %s4093_s21, %s4144_s7 }
 0x3c3   : > { %p2838_p13 = scmp.lt.u32.totalorder %s2836_s14, %s2832_s9  ;;  %p2840_p1 = scmp.lt.u32.totalorder %s2832_s9, %s4093_s21 }
 0x3c4   : > { %p2834_p10 = pnand %p2833_p7, %p2968_p6 }
 0x3c5   : > { %p2839_p0 = por %p2838_p13, %p2837_p12 }
 0x3c6   : > { %p2835_p11 = pneg %p2834_p10 }
 0x3c7   : > { %p2841_p2 = por %p2840_p1, %p2839_p0 }
 0x3c9   : > { %p2842_p3 = pnand %p2841_p2, %p2835_p11 }
 0x3cb   : > { %2845 = shalt.err (!%p2842_p3)
}
 0x3cc   : > { %2769 = dma.vmem_to_hbm [thread:$0]  (%p2968_p6), %s4095_s18, 16, %s4093_s21, %s2380_s22  }
 0x3cd PF: > { %s2404_s17 = sand.u32 1, %s2868_s26   ;;  %p2772_p4 = pnand %p2455_p9, %p2972_p8 }
 0x3ce   : > { %s2405_s19 = scalar_lea.sflag [#allocation5], %s2404_s17 }
 0x3cf   : > { %2863 = dma.done.wait (!%p2772_p4), %s2405_s19, 16  }
 0x3d0   : > { %2865 = vsyncadd (!%p2772_p4), %s2405_s19, 4294967280  ;;  %p19_p5 = scmp.ge.s32.totalorder %s2953_s8, 4   ;;  %s4149_s26 = smov %s2872_s27 }
 0x3d1   : > { %s4150_s27 = smov %s2876_s28  ;;  %s4151_s28 = smov %s2966_s11 }
 0x3d2   : > { %s4152_s29 = smov %s2953_s8  ;;  %21 = sbr.rel (!%p19_p5) target bundleno = 6 (0x6), region = 126 }
 0x3d9   :  { %2409 = vsyncpa [#allocation5], 1 }
 0x3da   :  { %2411 = vsyncpa [#allocation5 + $0x1], 1 }

</bundles_post_ra>
